<compile_context>
chip_gen: v7x
topology: tpu7x:2x2x1
jax: 0.10.0
libtpu: 0.0.40
codegen_flags: <defaults>
</compile_context>

<pallas_src>
import functools

import jax
import jax.numpy as jnp
from jax import lax
from jax.experimental import pallas as pl
from jax.experimental.pallas import tpu as pltpu


# ---------------------------------------------------------------------------
# helpers
# ---------------------------------------------------------------------------
def _pick_chunk(T, max_chunk=128):
    """Largest divisor of T not exceeding max_chunk (bounds the xg scratch)."""
    if T <= max_chunk:
        return T
    for c in range(max_chunk, 0, -1):
        if T % c == 0:
            return c
    return 1


def _pick_row_tile(m, target=512):
    """Row tile for the head kernel: multiple of 8 dividing m, near target."""
    if m <= target:
        return m
    for t in range(target, 7, -8):
        if m % t == 0:
            return t
    return m


# ---------------------------------------------------------------------------
# Kernel 1: one fused bidirectional LSTM layer over the full sequence.
# ---------------------------------------------------------------------------
def _bilstm_layer_kernel(x_ref, wih_f_ref, wih_r_ref, whh_ref, bf_ref, br_ref,
                         out_ref, xg_ref, *, chunk):
    """Fused fwd+rev LSTM layer.

    x_ref:     (T, B, D)      time-major layer input
    wih_f_ref: (D, 4H)        forward input->gate weights, transposed (i,f,g,o)
    wih_r_ref: (D, 4H)        reverse input->gate weights, transposed
    whh_ref:   (H, 8H)        [Whh_fwd^T | Whh_rev^T] packed (wide-N recurrence)
    bf_ref:    (1, 4H)        b_ih_fwd + b_hh_fwd
    br_ref:    (1, 4H)        b_ih_rev + b_hh_rev
    out_ref:   (T, B, 2H)     [h_fwd | h_rev] per timestep (rev already un-reversed)
    xg_ref:    (chunk, B, 8H) scratch: per-chunk precomputed input projections
    """
    T, B, D = x_ref.shape
    H = whh_ref.shape[0]
    H4 = 4 * H
    n_chunks = T // chunk
    cb = chunk * B

    def chunk_body(ci, carry):
        h_in, c_in = carry
        f_start = pl.multiple_of(ci * chunk, chunk)              # fwd chunk start
        r_start = pl.multiple_of(T - (ci + 1) * chunk, chunk)    # rev chunk start

        # ---- input projection for this chunk, both directions (MXU) -------
        xf = x_ref[pl.ds(f_start, chunk)].reshape(cb, D)
        xr = x_ref[pl.ds(r_start, chunk)].reshape(cb, D)
        xg_ref[:, :, 0:H4] = (
            jnp.dot(xf, wih_f_ref[...], preferred_element_type=jnp.float32)
            + bf_ref[...]).reshape(chunk, B, H4)
        xg_ref[:, :, H4:2 * H4] = (
            jnp.dot(xr, wih_r_ref[...], preferred_element_type=jnp.float32)
            + br_ref[...]).reshape(chunk, B, H4)

        # ---- recurrence over this chunk (h, c live in the loop carry) -----
        def step(j, carry2):
            h, c = carry2
            rec = jnp.dot(h, whh_ref[...], preferred_element_type=jnp.float32)
            g_f = xg_ref[j, :, 0:H4] + rec[0:B, 0:H4]
            g_r = xg_ref[chunk - 1 - j, :, H4:2 * H4] + rec[B:2 * B, H4:2 * H4]
            gates = jnp.concatenate([g_f, g_r], axis=0)          # (2B, 4H)
            # TODO(synk): gate slices at H offsets are not lane-aligned unless
            # H % 128 == 0; padding H would make these full-vreg operands.
            i = jax.nn.sigmoid(gates[:, 0 * H:1 * H])
            f = jax.nn.sigmoid(gates[:, 1 * H:2 * H])
            g = jnp.tanh(gates[:, 2 * H:3 * H])
            o = jax.nn.sigmoid(gates[:, 3 * H:4 * H])
            c_new = f * c + i * g
            h_new = o * jnp.tanh(c_new)
            tf = f_start + j                  # global forward time
            tr = T - 1 - tf                   # global reverse time
            out_ref[tf, :, 0:H] = h_new[0:B, :]
            out_ref[tr, :, H:2 * H] = h_new[B:2 * B, :]
            return (h_new, c_new)

        return lax.fori_loop(0, chunk, step, (h_in, c_in))

    zeros = jnp.zeros((2 * B, H), jnp.float32)   # PyTorch default zero h0/c0
    lax.fori_loop(0, n_chunks, chunk_body, (zeros, zeros))


def bilstm_layer(x_tmajor, layer_w, *, chunk):
    """x_tmajor: (T, B, D) -> (T, B, 2H) with [fwd | rev] halves."""
    T, B, D = x_tmajor.shape
    wih_f_t, wih_r_t, whh_t, b_f, b_r = layer_w
    H = whh_t.shape[0]
    vmem = pl.BlockSpec(memory_space=pltpu.MemorySpace.VMEM)
    needed = 4 * (x_tmajor.size + T * B * 2 * H + chunk * B * 8 * H
                  + wih_f_t.size + wih_r_t.size + whh_t.size
                  + b_f.size + b_r.size)
    vmem_limit = int(min(max(32 << 20, 2 * needed), 64 << 20))
    return pl.pallas_call(
        functools.partial(_bilstm_layer_kernel, chunk=chunk),
        out_shape=jax.ShapeDtypeStruct((T, B, 2 * H), jnp.float32),
        in_specs=[vmem] * 6,
        out_specs=vmem,
        scratch_shapes=[pltpu.VMEM((chunk, B, 8 * H), jnp.float32)],
        compiler_params=pltpu.CompilerParams(vmem_limit_bytes=vmem_limit),
    )(x_tmajor, wih_f_t, wih_r_t, whh_t, b_f, b_r)


# ---------------------------------------------------------------------------
# Kernel 2: fused (BN-folded) Linear + grouped L2 normalize, gridded over rows.
# ---------------------------------------------------------------------------
def _head_kernel(x_ref, w_ref, b_ref, o_ref, *, freq, emb):
    """x_ref: (TM, 2H); w_ref: (2H, F*E); o_ref: (TM, F*E)."""
    z = jnp.dot(x_ref[...], w_ref[...], preferred_element_type=jnp.float32)
    z = z + b_ref[...]
    m = z.shape[0]
    z3 = z.reshape(m, freq, emb)                       # groups of E per freq bin
    ss = jnp.sum(z3 * z3, axis=-1, keepdims=True)      # lane reduction, no G mat
    inv = lax.rsqrt(jnp.maximum(ss, 1e-24))            # == 1 / max(||z||, 1e-12)
    o_ref[...] = (z3 * inv).reshape(m, freq * emb)


def head(flat, w_fc_t, b_fc, *, freq, emb, row_tile=512):
    M, K = flat.shape
    EF = freq * emb
    tm = _pick_row_tile(M, row_tile)
    return pl.pallas_call(
        functools.partial(_head_kernel, freq=freq, emb=emb),
        out_shape=jax.ShapeDtypeStruct((M, EF), jnp.float32),
        grid=(M // tm,),
        in_specs=[pl.BlockSpec((tm, K), lambda i: (i, 0)),
                  pl.BlockSpec((K, EF), lambda i: (0, 0)),
                  pl.BlockSpec((1, EF), lambda i: (0, 0))],
        out_specs=pl.BlockSpec((tm, EF), lambda i: (i, 0)),
        compiler_params=pltpu.CompilerParams(
            dimension_semantics=("parallel",)),
    )(flat, w_fc_t, b_fc)


# ---------------------------------------------------------------------------
# One-time parameter preparation (transposes / packing / BN fold hoisted here).
# ---------------------------------------------------------------------------
def prepare_params(params, *, num_layers):
    layers = []
    for l in range(num_layers):
        wih_f = params[f"weight_ih_l{l}"]
        wih_r = params[f"weight_ih_l{l}_reverse"]
        whh_f = params[f"weight_hh_l{l}"]
        whh_r = params[f"weight_hh_l{l}_reverse"]
        b_f = params[f"bias_ih_l{l}"] + params[f"bias_hh_l{l}"]
        b_r = params[f"bias_ih_l{l}_reverse"] + params[f"bias_hh_l{l}_reverse"]
        layers.append((
            jnp.transpose(wih_f),                                    # (D, 4H)
            jnp.transpose(wih_r),                                    # (D, 4H)
            jnp.concatenate([jnp.transpose(whh_f),
                             jnp.transpose(whh_r)], axis=1),         # (H, 8H)
            b_f.reshape(1, -1),
            b_r.reshape(1, -1),
        ))
    # Eval-mode BatchNorm folded exactly into the fc_dc affine.
    # TODO(synk): training-mode BN (batch statistics) not implemented.
    eps = 1e-5
    scale = params["bn_gamma"] / jnp.sqrt(params["bn_var"] + eps)    # (2H,)
    shift = params["bn_beta"] - params["bn_mean"] * scale            # (2H,)
    w_fold = params["fc_w"] * scale[None, :]                         # (EF, 2H)
    b_fold = params["fc_b"] + params["fc_w"] @ shift                 # (EF,)
    return tuple(layers), (jnp.transpose(w_fold), b_fold.reshape(1, -1))


# ---------------------------------------------------------------------------
# Full forward.
# ---------------------------------------------------------------------------
def deep_clustering_forward(x, prepared, *, embedding_dim):
    layers, (w_fc_t, b_fc) = prepared
    B, T, Fdim = x.shape
    chunk = _pick_chunk(T)

    # Keep everything time-major between layers (no per-layer transposes/flips).
    h = jnp.transpose(x.astype(jnp.float32), (1, 0, 2))      # (T, B, F)
    for layer_w in layers:
        # TODO(synk): nn.LSTM inter-layer dropout (p=0.3) is training-only RNG;
        # eval-mode semantics (no dropout) implemented here.
        h = bilstm_layer(h, layer_w, chunk=chunk)             # (T, B, 2H)

    H2 = h.shape[-1]
    rnn_bt = jnp.transpose(h, (1, 0, 2)).reshape(B * T, H2)   # (B*T, 2H)
    emb = head(rnn_bt, w_fc_t, b_fc, freq=Fdim, emb=embedding_dim)
    # view(B, T*F, E) -> L2 normalize (in kernel) -> reshape(B, T, F, E)
    return emb.reshape(B, T, Fdim, embedding_dim)


# ---------------------------------------------------------------------------
# Deterministic parameter init (shapes from the module's __init__).
# ---------------------------------------------------------------------------
def init_params(key, input_dim, hidden_dim, num_layers, embedding_dim):
    H = hidden_dim
    params = {}
    for l in range(num_layers):
        in_dim = input_dim if l == 0 else 2 * H
        for d in range(2):
            suffix = f"l{l}" + ("_reverse" if d == 1 else "")
            key, k1, k2, k3, k4 = jax.random.split(key, 5)
            params[f"weight_ih_{suffix}"] = 0.1 * jax.random.normal(
                k1, (4 * H, in_dim), jnp.float32)
            params[f"weight_hh_{suffix}"] = 0.1 * jax.random.normal(
                k2, (4 * H, H), jnp.float32)
            params[f"bias_ih_{suffix}"] = 0.1 * jax.random.normal(
                k3, (4 * H,), jnp.float32)
            params[f"bias_hh_{suffix}"] = 0.1 * jax.random.normal(
                k4, (4 * H,), jnp.float32)
    key, k1, k2, k3, k4 = jax.random.split(key, 5)
    params["bn_gamma"] = 1.0 + 0.1 * jax.random.normal(k1, (2 * H,), jnp.float32)
    params["bn_beta"] = 0.1 * jax.random.normal(k2, (2 * H,), jnp.float32)
    params["bn_mean"] = jnp.zeros((2 * H,), jnp.float32)   # PyTorch init
    params["bn_var"] = jnp.ones((2 * H,), jnp.float32)     # PyTorch init
    params["fc_w"] = 0.1 * jax.random.normal(
        k3, (embedding_dim * input_dim, 2 * H), jnp.float32)
    params["fc_b"] = 0.1 * jax.random.normal(
        k4, (embedding_dim * input_dim,), jnp.float32)
    return params


if __name__ == "__main__":
    # small shapes: batch=2, frames(seq)=8, frequency(input_dim)=16,
    # hidden_dim=32, num_layers=3, embedding_dim=4
    B, T, Fdim = 2, 8, 16
    H, L, E = 32, 3, 4

    key = jax.random.PRNGKey(0)
    kx, kp = jax.random.split(key)
    x = jax.random.normal(kx, (B, T, Fdim), jnp.float32)
    params = init_params(kp, Fdim, H, L, E)
    prepared = prepare_params(params, num_layers=L)   # one-time weight prep

    fwd = jax.jit(functools.partial(deep_clustering_forward, embedding_dim=E))
    out = fwd(x, prepared)
    out = jax.block_until_ready(out)

    assert out.shape == (B, T, Fdim, E), out.shape
    assert bool(jnp.all(jnp.isfinite(out)))
    # embeddings are L2-normalized along the last dim
    norms = jnp.sqrt(jnp.sum(out * out, axis=-1))
    assert bool(jnp.all(jnp.abs(norms - 1.0) < 1e-3))
    print("KERNEL_OK")
</pallas_src>

<mosaic_0001>
module attributes {stable_mosaic.version = 11 : i64} {
  func.func @_bilstm_layer_kernel(%arg0: memref<8x2x16xf32, #tpu.memory_space<vmem>>, %arg1: memref<16x128xf32, #tpu.memory_space<vmem>>, %arg2: memref<16x128xf32, #tpu.memory_space<vmem>>, %arg3: memref<32x256xf32, #tpu.memory_space<vmem>>, %arg4: memref<1x128xf32, #tpu.memory_space<vmem>>, %arg5: memref<1x128xf32, #tpu.memory_space<vmem>>, %arg6: memref<8x2x64xf32, #tpu.memory_space<vmem>>, %arg7: memref<8x2x256xf32, #tpu.memory_space<vmem>>) attributes {dimension_semantics = [], scalar_prefetch = 0 : i64, scratch_operands = 1 : i64, tpu.core_type = #tpu.core_type<tc>} {
    %cst = arith.constant 0.000000e+00 : f32
    %0 = vector.broadcast %cst : f32 to vector<4x32xf32>
    %c0_i32 = arith.constant 0 : i32
    %c8_i32 = arith.constant 8 : i32
    %1 = arith.muli %c0_i32, %c8_i32 : i32
    %2 = tpu.assume_multiple %1, 8 : i32
    %c1_i32 = arith.constant 1 : i32
    %3 = arith.addi %c0_i32, %c1_i32 : i32
    %c8_i32_0 = arith.constant 8 : i32
    %4 = arith.muli %3, %c8_i32_0 : i32
    %c8_i32_1 = arith.constant 8 : i32
    %5 = arith.subi %c8_i32_1, %4 : i32
    %6 = tpu.assume_multiple %5, 8 : i32
    %7 = arith.index_cast %2 : i32 to index
    %c0 = arith.constant 0 : index
    %c0_2 = arith.constant 0 : index
    %8 = vector.load %arg0[%7, %c0, %c0_2] : memref<8x2x16xf32, #tpu.memory_space<vmem>>, vector<8x2x16xf32>
    %9 = vector.shape_cast %8 : vector<8x2x16xf32> to vector<16x16xf32>
    %10 = arith.index_cast %6 : i32 to index
    %c0_3 = arith.constant 0 : index
    %c0_4 = arith.constant 0 : index
    %11 = vector.load %arg0[%10, %c0_3, %c0_4] : memref<8x2x16xf32, #tpu.memory_space<vmem>>, vector<8x2x16xf32>
    %12 = vector.shape_cast %11 : vector<8x2x16xf32> to vector<16x16xf32>
    %c0_5 = arith.constant 0 : index
    %c0_6 = arith.constant 0 : index
    %13 = vector.load %arg1[%c0_5, %c0_6] : memref<16x128xf32, #tpu.memory_space<vmem>>, vector<16x128xf32>
    %cst_7 = arith.constant dense<0.000000e+00> : vector<16x128xf32>
    %14 = tpu.matmul %9, %13, %cst_7 {dimension_numbers = #tpu.dot_dimension_numbers<[1], [0], [0], [1], [0, 0, 1, 1], [], []>} : vector<16x16xf32>, vector<16x128xf32>, vector<16x128xf32> -> vector<16x128xf32>
    %c0_8 = arith.constant 0 : index
    %c0_9 = arith.constant 0 : index
    %15 = vector.load %arg4[%c0_8, %c0_9] : memref<1x128xf32, #tpu.memory_space<vmem>>, vector<1x128xf32>
    %16 = vector.broadcast %15 : vector<1x128xf32> to vector<16x128xf32>
    %17 = arith.addf %14, %16 : vector<16x128xf32>
    %18 = vector.shape_cast %17 : vector<16x128xf32> to vector<8x2x128xf32>
    %c0_10 = arith.constant 0 : index
    %c0_11 = arith.constant 0 : index
    %c0_12 = arith.constant 0 : index
    %19 = vector.load %arg7[%c0_10, %c0_11, %c0_12] : memref<8x2x256xf32, #tpu.memory_space<vmem>>, vector<8x2x128xf32>
    tpu.vector_store %arg7[%c0_10, %c0_11, %c0_12], %18 {strides = array<i32>} : memref<8x2x256xf32, #tpu.memory_space<vmem>>, vector<8x2x128xf32>,
    %c0_13 = arith.constant 0 : index
    %c0_14 = arith.constant 0 : index
    %20 = vector.load %arg2[%c0_13, %c0_14] : memref<16x128xf32, #tpu.memory_space<vmem>>, vector<16x128xf32>
    %cst_15 = arith.constant dense<0.000000e+00> : vector<16x128xf32>
    %21 = tpu.matmul %12, %20, %cst_15 {dimension_numbers = #tpu.dot_dimension_numbers<[1], [0], [0], [1], [0, 0, 1, 1], [], []>} : vector<16x16xf32>, vector<16x128xf32>, vector<16x128xf32> -> vector<16x128xf32>
    %c0_16 = arith.constant 0 : index
    %c0_17 = arith.constant 0 : index
    %22 = vector.load %arg5[%c0_16, %c0_17] : memref<1x128xf32, #tpu.memory_space<vmem>>, vector<1x128xf32>
    %23 = vector.broadcast %22 : vector<1x128xf32> to vector<16x128xf32>
    %24 = arith.addf %21, %23 : vector<16x128xf32>
    %25 = vector.shape_cast %24 : vector<16x128xf32> to vector<8x2x128xf32>
    %c0_18 = arith.constant 0 : index
    %c0_19 = arith.constant 0 : index
    %c128 = arith.constant 128 : index
    %26 = vector.load %arg7[%c0_18, %c0_19, %c128] : memref<8x2x256xf32, #tpu.memory_space<vmem>>, vector<8x2x128xf32>
    tpu.vector_store %arg7[%c0_18, %c0_19, %c128], %25 {strides = array<i32>} : memref<8x2x256xf32, #tpu.memory_space<vmem>>, vector<8x2x128xf32>,
    %c0_i32_20 = arith.constant 0 : i32
    %c8_i32_21 = arith.constant 8 : i32
    %27 = arith.addi %c0_i32_20, %c8_i32_21 : i32
    %c1_i32_22 = arith.constant 1 : i32
    %28:2 = scf.for %arg8 = %c0_i32_20 to %27 step %c1_i32_22 iter_args(%arg9 = %0, %arg10 = %0) -> (vector<4x32xf32>, vector<4x32xf32>)  : i32 {
      %c0_25 = arith.constant 0 : index
      %c0_26 = arith.constant 0 : index
      %29 = vector.load %arg3[%c0_25, %c0_26] : memref<32x256xf32, #tpu.memory_space<vmem>>, vector<32x256xf32>
      %cst_27 = arith.constant dense<0.000000e+00> : vector<4x256xf32>
      %30 = tpu.matmul %arg9, %29, %cst_27 {dimension_numbers = #tpu.dot_dimension_numbers<[1], [0], [0], [1], [0, 0, 1, 1], [], []>} : vector<4x32xf32>, vector<32x256xf32>, vector<4x256xf32> -> vector<4x256xf32>
      %31 = arith.index_cast %arg8 : i32 to index
      %c0_28 = arith.constant 0 : index
      %c0_29 = arith.constant 0 : index
      %32 = vector.load %arg7[%31, %c0_28, %c0_29] : memref<8x2x256xf32, #tpu.memory_space<vmem>>, vector<1x2x128xf32>
      %33 = vector.shape_cast %32 : vector<1x2x128xf32> to vector<2x128xf32>
      %34 = vector.extract_strided_slice %30 {offsets = [0, 0], sizes = [2, 128], strides = [1, 1]} : vector<4x256xf32> to vector<2x128xf32>
      %35 = arith.addf %33, %34 : vector<2x128xf32>
      %c7_i32 = arith.constant 7 : i32
      %36 = arith.subi %c7_i32, %arg8 : i32
      %37 = arith.index_cast %36 : i32 to index
      %c0_30 = arith.constant 0 : index
      %c128_31 = arith.constant 128 : index
      %38 = vector.load %arg7[%37, %c0_30, %c128_31] : memref<8x2x256xf32, #tpu.memory_space<vmem>>, vector<1x2x128xf32>
      %39 = vector.shape_cast %38 : vector<1x2x128xf32> to vector<2x128xf32>
      %40 = vector.extract_strided_slice %30 {offsets = [2, 128], sizes = [2, 128], strides = [1, 1]} : vector<4x256xf32> to vector<2x128xf32>
      %41 = arith.addf %39, %40 : vector<2x128xf32>
      %42 = tpu.concatenate %35, %41 in 0 : vector<2x128xf32>, vector<2x128xf32> -> vector<4x128xf32>
      %43 = vector.extract_strided_slice %42 {offsets = [0, 0], sizes = [4, 32], strides = [1, 1]} : vector<4x128xf32> to vector<4x32xf32>
      %44 = arith.negf %43 : vector<4x32xf32>
      %45 = math.exp %44 : vector<4x32xf32>
      %cst_32 = arith.constant 1.000000e+00 : f32
      %46 = vector.broadcast %cst_32 : f32 to vector<4x32xf32>
      %47 = arith.addf %46, %45 : vector<4x32xf32>
      %48 = arith.divf %46, %47 : vector<4x32xf32>
      %49 = vector.extract_strided_slice %42 {offsets = [0, 32], sizes = [4, 32], strides = [1, 1]} : vector<4x128xf32> to vector<4x32xf32>
      %50 = arith.negf %49 : vector<4x32xf32>
      %51 = math.exp %50 : vector<4x32xf32>
      %cst_33 = arith.constant 1.000000e+00 : f32
      %52 = vector.broadcast %cst_33 : f32 to vector<4x32xf32>
      %53 = arith.addf %52, %51 : vector<4x32xf32>
      %54 = arith.divf %52, %53 : vector<4x32xf32>
      %55 = vector.extract_strided_slice %42 {offsets = [0, 64], sizes = [4, 32], strides = [1, 1]} : vector<4x128xf32> to vector<4x32xf32>
      %56 = math.tanh %55 : vector<4x32xf32>
      %57 = vector.extract_strided_slice %42 {offsets = [0, 96], sizes = [4, 32], strides = [1, 1]} : vector<4x128xf32> to vector<4x32xf32>
      %58 = arith.negf %57 : vector<4x32xf32>
      %59 = math.exp %58 : vector<4x32xf32>
      %cst_34 = arith.constant 1.000000e+00 : f32
      %60 = vector.broadcast %cst_34 : f32 to vector<4x32xf32>
      %61 = arith.addf %60, %59 : vector<4x32xf32>
      %62 = arith.divf %60, %61 : vector<4x32xf32>
      %63 = arith.mulf %54, %arg10 : vector<4x32xf32>
      %64 = arith.mulf %48, %56 : vector<4x32xf32>
      %65 = arith.addf %63, %64 : vector<4x32xf32>
      %66 = math.tanh %65 : vector<4x32xf32>
      %67 = arith.mulf %62, %66 : vector<4x32xf32>
      %68 = arith.addi %2, %arg8 : i32
      %c7_i32_35 = arith.constant 7 : i32
      %69 = arith.subi %c7_i32_35, %68 : i32
      %70 = vector.extract_strided_slice %67 {offsets = [0, 0], sizes = [2, 32], strides = [1, 1]} : vector<4x32xf32> to vector<2x32xf32>
      %71 = arith.index_cast %68 : i32 to index
      %c0_36 = arith.constant 0 : index
      %c0_37 = arith.constant 0 : index
      %72 = vector.load %arg6[%71, %c0_36, %c0_37] : memref<8x2x64xf32, #tpu.memory_space<vmem>>, vector<1x2x32xf32>
      %73 = vector.shape_cast %72 : vector<1x2x32xf32> to vector<2x32xf32>
      %74 = vector.shape_cast %70 : vector<2x32xf32> to vector<1x2x32xf32>
      tpu.vector_store %arg6[%71, %c0_36, %c0_37], %74 {strides = array<i32>} : memref<8x2x64xf32, #tpu.memory_space<vmem>>, vector<1x2x32xf32>,
      %75 = vector.extract_strided_slice %67 {offsets = [2, 0], sizes = [2, 32], strides = [1, 1]} : vector<4x32xf32> to vector<2x32xf32>
      %76 = arith.index_cast %69 : i32 to index
      %c0_38 = arith.constant 0 : index
      %c32 = arith.constant 32 : index
      %77 = vector.load %arg6[%76, %c0_38, %c32] : memref<8x2x64xf32, #tpu.memory_space<vmem>>, vector<1x2x32xf32>
      %78 = vector.shape_cast %77 : vector<1x2x32xf32> to vector<2x32xf32>
      %79 = vector.shape_cast %75 : vector<2x32xf32> to vector<1x2x32xf32>
      tpu.vector_store %arg6[%76, %c0_38, %c32], %79 {strides = array<i32>} : memref<8x2x64xf32, #tpu.memory_space<vmem>>, vector<1x2x32xf32>,
      scf.yield %67, %65 : vector<4x32xf32>, vector<4x32xf32>
    }
    %c8_i32_23 = arith.constant 8 : i32
    %c1_i32_24 = arith.constant 1 : i32
    return
  }
}

module attributes {stable_mosaic.version = 11 : i64} {
  func.func @_bilstm_layer_kernel(%arg0: memref<8x2x64xf32, #tpu.memory_space<vmem>>, %arg1: memref<64x128xf32, #tpu.memory_space<vmem>>, %arg2: memref<64x128xf32, #tpu.memory_space<vmem>>, %arg3: memref<32x256xf32, #tpu.memory_space<vmem>>, %arg4: memref<1x128xf32, #tpu.memory_space<vmem>>, %arg5: memref<1x128xf32, #tpu.memory_space<vmem>>, %arg6: memref<8x2x64xf32, #tpu.memory_space<vmem>>, %arg7: memref<8x2x256xf32, #tpu.memory_space<vmem>>) attributes {dimension_semantics = [], scalar_prefetch = 0 : i64, scratch_operands = 1 : i64, tpu.core_type = #tpu.core_type<tc>} {
    %cst = arith.constant 0.000000e+00 : f32
    %0 = vector.broadcast %cst : f32 to vector<4x32xf32>
    %c0_i32 = arith.constant 0 : i32
    %c8_i32 = arith.constant 8 : i32
    %1 = arith.muli %c0_i32, %c8_i32 : i32
    %2 = tpu.assume_multiple %1, 8 : i32
    %c1_i32 = arith.constant 1 : i32
    %3 = arith.addi %c0_i32, %c1_i32 : i32
    %c8_i32_0 = arith.constant 8 : i32
    %4 = arith.muli %3, %c8_i32_0 : i32
    %c8_i32_1 = arith.constant 8 : i32
    %5 = arith.subi %c8_i32_1, %4 : i32
    %6 = tpu.assume_multiple %5, 8 : i32
    %7 = arith.index_cast %2 : i32 to index
    %c0 = arith.constant 0 : index
    %c0_2 = arith.constant 0 : index
    %8 = vector.load %arg0[%7, %c0, %c0_2] : memref<8x2x64xf32, #tpu.memory_space<vmem>>, vector<8x2x64xf32>
    %9 = vector.shape_cast %8 : vector<8x2x64xf32> to vector<16x64xf32>
    %10 = arith.index_cast %6 : i32 to index
    %c0_3 = arith.constant 0 : index
    %c0_4 = arith.constant 0 : index
    %11 = vector.load %arg0[%10, %c0_3, %c0_4] : memref<8x2x64xf32, #tpu.memory_space<vmem>>, vector<8x2x64xf32>
    %12 = vector.shape_cast %11 : vector<8x2x64xf32> to vector<16x64xf32>
    %c0_5 = arith.constant 0 : index
    %c0_6 = arith.constant 0 : index
    %13 = vector.load %arg1[%c0_5, %c0_6] : memref<64x128xf32, #tpu.memory_space<vmem>>, vector<64x128xf32>
    %cst_7 = arith.constant dense<0.000000e+00> : vector<16x128xf32>
    %14 = tpu.matmul %9, %13, %cst_7 {dimension_numbers = #tpu.dot_dimension_numbers<[1], [0], [0], [1], [0, 0, 1, 1], [], []>} : vector<16x64xf32>, vector<64x128xf32>, vector<16x128xf32> -> vector<16x128xf32>
    %c0_8 = arith.constant 0 : index
    %c0_9 = arith.constant 0 : index
    %15 = vector.load %arg4[%c0_8, %c0_9] : memref<1x128xf32, #tpu.memory_space<vmem>>, vector<1x128xf32>
    %16 = vector.broadcast %15 : vector<1x128xf32> to vector<16x128xf32>
    %17 = arith.addf %14, %16 : vector<16x128xf32>
    %18 = vector.shape_cast %17 : vector<16x128xf32> to vector<8x2x128xf32>
    %c0_10 = arith.constant 0 : index
    %c0_11 = arith.constant 0 : index
    %c0_12 = arith.constant 0 : index
    %19 = vector.load %arg7[%c0_10, %c0_11, %c0_12] : memref<8x2x256xf32, #tpu.memory_space<vmem>>, vector<8x2x128xf32>
    tpu.vector_store %arg7[%c0_10, %c0_11, %c0_12], %18 {strides = array<i32>} : memref<8x2x256xf32, #tpu.memory_space<vmem>>, vector<8x2x128xf32>,
    %c0_13 = arith.constant 0 : index
    %c0_14 = arith.constant 0 : index
    %20 = vector.load %arg2[%c0_13, %c0_14] : memref<64x128xf32, #tpu.memory_space<vmem>>, vector<64x128xf32>
    %cst_15 = arith.constant dense<0.000000e+00> : vector<16x128xf32>
    %21 = tpu.matmul %12, %20, %cst_15 {dimension_numbers = #tpu.dot_dimension_numbers<[1], [0], [0], [1], [0, 0, 1, 1], [], []>} : vector<16x64xf32>, vector<64x128xf32>, vector<16x128xf32> -> vector<16x128xf32>
    %c0_16 = arith.constant 0 : index
    %c0_17 = arith.constant 0 : index
    %22 = vector.load %arg5[%c0_16, %c0_17] : memref<1x128xf32, #tpu.memory_space<vmem>>, vector<1x128xf32>
    %23 = vector.broadcast %22 : vector<1x128xf32> to vector<16x128xf32>
    %24 = arith.addf %21, %23 : vector<16x128xf32>
    %25 = vector.shape_cast %24 : vector<16x128xf32> to vector<8x2x128xf32>
    %c0_18 = arith.constant 0 : index
    %c0_19 = arith.constant 0 : index
    %c128 = arith.constant 128 : index
    %26 = vector.load %arg7[%c0_18, %c0_19, %c128] : memref<8x2x256xf32, #tpu.memory_space<vmem>>, vector<8x2x128xf32>
    tpu.vector_store %arg7[%c0_18, %c0_19, %c128], %25 {strides = array<i32>} : memref<8x2x256xf32, #tpu.memory_space<vmem>>, vector<8x2x128xf32>,
    %c0_i32_20 = arith.constant 0 : i32
    %c8_i32_21 = arith.constant 8 : i32
    %27 = arith.addi %c0_i32_20, %c8_i32_21 : i32
    %c1_i32_22 = arith.constant 1 : i32
    %28:2 = scf.for %arg8 = %c0_i32_20 to %27 step %c1_i32_22 iter_args(%arg9 = %0, %arg10 = %0) -> (vector<4x32xf32>, vector<4x32xf32>)  : i32 {
      %c0_25 = arith.constant 0 : index
      %c0_26 = arith.constant 0 : index
      %29 = vector.load %arg3[%c0_25, %c0_26] : memref<32x256xf32, #tpu.memory_space<vmem>>, vector<32x256xf32>
      %cst_27 = arith.constant dense<0.000000e+00> : vector<4x256xf32>
      %30 = tpu.matmul %arg9, %29, %cst_27 {dimension_numbers = #tpu.dot_dimension_numbers<[1], [0], [0], [1], [0, 0, 1, 1], [], []>} : vector<4x32xf32>, vector<32x256xf32>, vector<4x256xf32> -> vector<4x256xf32>
      %31 = arith.index_cast %arg8 : i32 to index
      %c0_28 = arith.constant 0 : index
      %c0_29 = arith.constant 0 : index
      %32 = vector.load %arg7[%31, %c0_28, %c0_29] : memref<8x2x256xf32, #tpu.memory_space<vmem>>, vector<1x2x128xf32>
      %33 = vector.shape_cast %32 : vector<1x2x128xf32> to vector<2x128xf32>
      %34 = vector.extract_strided_slice %30 {offsets = [0, 0], sizes = [2, 128], strides = [1, 1]} : vector<4x256xf32> to vector<2x128xf32>
      %35 = arith.addf %33, %34 : vector<2x128xf32>
      %c7_i32 = arith.constant 7 : i32
      %36 = arith.subi %c7_i32, %arg8 : i32
      %37 = arith.index_cast %36 : i32 to index
      %c0_30 = arith.constant 0 : index
      %c128_31 = arith.constant 128 : index
      %38 = vector.load %arg7[%37, %c0_30, %c128_31] : memref<8x2x256xf32, #tpu.memory_space<vmem>>, vector<1x2x128xf32>
      %39 = vector.shape_cast %38 : vector<1x2x128xf32> to vector<2x128xf32>
      %40 = vector.extract_strided_slice %30 {offsets = [2, 128], sizes = [2, 128], strides = [1, 1]} : vector<4x256xf32> to vector<2x128xf32>
      %41 = arith.addf %39, %40 : vector<2x128xf32>
      %42 = tpu.concatenate %35, %41 in 0 : vector<2x128xf32>, vector<2x128xf32> -> vector<4x128xf32>
      %43 = vector.extract_strided_slice %42 {offsets = [0, 0], sizes = [4, 32], strides = [1, 1]} : vector<4x128xf32> to vector<4x32xf32>
      %44 = arith.negf %43 : vector<4x32xf32>
      %45 = math.exp %44 : vector<4x32xf32>
      %cst_32 = arith.constant 1.000000e+00 : f32
      %46 = vector.broadcast %cst_32 : f32 to vector<4x32xf32>
      %47 = arith.addf %46, %45 : vector<4x32xf32>
      %48 = arith.divf %46, %47 : vector<4x32xf32>
      %49 = vector.extract_strided_slice %42 {offsets = [0, 32], sizes = [4, 32], strides = [1, 1]} : vector<4x128xf32> to vector<4x32xf32>
      %50 = arith.negf %49 : vector<4x32xf32>
      %51 = math.exp %50 : vector<4x32xf32>
      %cst_33 = arith.constant 1.000000e+00 : f32
      %52 = vector.broadcast %cst_33 : f32 to vector<4x32xf32>
      %53 = arith.addf %52, %51 : vector<4x32xf32>
      %54 = arith.divf %52, %53 : vector<4x32xf32>
      %55 = vector.extract_strided_slice %42 {offsets = [0, 64], sizes = [4, 32], strides = [1, 1]} : vector<4x128xf32> to vector<4x32xf32>
      %56 = math.tanh %55 : vector<4x32xf32>
      %57 = vector.extract_strided_slice %42 {offsets = [0, 96], sizes = [4, 32], strides = [1, 1]} : vector<4x128xf32> to vector<4x32xf32>
      %58 = arith.negf %57 : vector<4x32xf32>
      %59 = math.exp %58 : vector<4x32xf32>
      %cst_34 = arith.constant 1.000000e+00 : f32
      %60 = vector.broadcast %cst_34 : f32 to vector<4x32xf32>
      %61 = arith.addf %60, %59 : vector<4x32xf32>
      %62 = arith.divf %60, %61 : vector<4x32xf32>
      %63 = arith.mulf %54, %arg10 : vector<4x32xf32>
      %64 = arith.mulf %48, %56 : vector<4x32xf32>
      %65 = arith.addf %63, %64 : vector<4x32xf32>
      %66 = math.tanh %65 : vector<4x32xf32>
      %67 = arith.mulf %62, %66 : vector<4x32xf32>
      %68 = arith.addi %2, %arg8 : i32
      %c7_i32_35 = arith.constant 7 : i32
      %69 = arith.subi %c7_i32_35, %68 : i32
      %70 = vector.extract_strided_slice %67 {offsets = [0, 0], sizes = [2, 32], strides = [1, 1]} : vector<4x32xf32> to vector<2x32xf32>
      %71 = arith.index_cast %68 : i32 to index
      %c0_36 = arith.constant 0 : index
      %c0_37 = arith.constant 0 : index
      %72 = vector.load %arg6[%71, %c0_36, %c0_37] : memref<8x2x64xf32, #tpu.memory_space<vmem>>, vector<1x2x32xf32>
      %73 = vector.shape_cast %72 : vector<1x2x32xf32> to vector<2x32xf32>
      %74 = vector.shape_cast %70 : vector<2x32xf32> to vector<1x2x32xf32>
      tpu.vector_store %arg6[%71, %c0_36, %c0_37], %74 {strides = array<i32>} : memref<8x2x64xf32, #tpu.memory_space<vmem>>, vector<1x2x32xf32>,
      %75 = vector.extract_strided_slice %67 {offsets = [2, 0], sizes = [2, 32], strides = [1, 1]} : vector<4x32xf32> to vector<2x32xf32>
      %76 = arith.index_cast %69 : i32 to index
      %c0_38 = arith.constant 0 : index
      %c32 = arith.constant 32 : index
      %77 = vector.load %arg6[%76, %c0_38, %c32] : memref<8x2x64xf32, #tpu.memory_space<vmem>>, vector<1x2x32xf32>
      %78 = vector.shape_cast %77 : vector<1x2x32xf32> to vector<2x32xf32>
      %79 = vector.shape_cast %75 : vector<2x32xf32> to vector<1x2x32xf32>
      tpu.vector_store %arg6[%76, %c0_38, %c32], %79 {strides = array<i32>} : memref<8x2x64xf32, #tpu.memory_space<vmem>>, vector<1x2x32xf32>,
      scf.yield %67, %65 : vector<4x32xf32>, vector<4x32xf32>
    }
    %c8_i32_23 = arith.constant 8 : i32
    %c1_i32_24 = arith.constant 1 : i32
    return
  }
}

module attributes {stable_mosaic.version = 11 : i64} {
  func.func @_head_kernel(%arg0: i32, %arg1: memref<16x64xf32, #tpu.memory_space<vmem>>, %arg2: memref<64x64xf32, #tpu.memory_space<vmem>>, %arg3: memref<1x64xf32, #tpu.memory_space<vmem>>, %arg4: memref<16x64xf32, #tpu.memory_space<vmem>>) attributes {dimension_semantics = [#tpu.dimension_semantics<parallel>], iteration_bounds = array<i64: 1>, scalar_prefetch = 0 : i64, scratch_operands = 0 : i64, tpu.core_type = #tpu.core_type<tc>, window_params = [{transform_indices = @transform_0, window_bounds = array<i64: 16, 64>}, {pipeline_mode = #tpu.pipeline_mode<synchronous>, transform_indices = @transform_1, window_bounds = array<i64: 64, 64>}, {pipeline_mode = #tpu.pipeline_mode<synchronous>, transform_indices = @transform_2, window_bounds = array<i64: 1, 64>}, {transform_indices = @transform_3, window_bounds = array<i64: 16, 64>}]} {
    %c0 = arith.constant 0 : index
    %c0_0 = arith.constant 0 : index
    %0 = vector.load %arg1[%c0, %c0_0] : memref<16x64xf32, #tpu.memory_space<vmem>>, vector<16x64xf32>
    %c0_1 = arith.constant 0 : index
    %c0_2 = arith.constant 0 : index
    %1 = vector.load %arg2[%c0_1, %c0_2] : memref<64x64xf32, #tpu.memory_space<vmem>>, vector<64x64xf32>
    %cst = arith.constant dense<0.000000e+00> : vector<16x64xf32>
    %2 = tpu.matmul %0, %1, %cst {dimension_numbers = #tpu.dot_dimension_numbers<[1], [0], [0], [1], [0, 0, 1, 1], [], []>} : vector<16x64xf32>, vector<64x64xf32>, vector<16x64xf32> -> vector<16x64xf32>
    %c0_3 = arith.constant 0 : index
    %c0_4 = arith.constant 0 : index
    %3 = vector.load %arg3[%c0_3, %c0_4] : memref<1x64xf32, #tpu.memory_space<vmem>>, vector<1x64xf32>
    %4 = vector.broadcast %3 : vector<1x64xf32> to vector<16x64xf32>
    %5 = arith.addf %2, %4 : vector<16x64xf32>
    %6 = vector.shape_cast %5 : vector<16x64xf32> to vector<16x16x4xf32>
    %7 = arith.mulf %6, %6 : vector<16x16x4xf32>
    %cst_5 = arith.constant dense<0.000000e+00> : vector<16x16xf32>
    %8 = vector.multi_reduction <add>, %7, %cst_5 [2] : vector<16x16x4xf32> to vector<16x16xf32>
    %9 = vector.shape_cast %8 : vector<16x16xf32> to vector<16x16x1xf32>
    %cst_6 = arith.constant 1.000000e-24 : f32
    %10 = vector.broadcast %cst_6 : f32 to vector<16x16x1xf32>
    %11 = arith.maximumf %9, %10 : vector<16x16x1xf32>
    %12 = math.rsqrt %11 : vector<16x16x1xf32>
    %13 = vector.broadcast %12 : vector<16x16x1xf32> to vector<16x16x4xf32>
    %14 = arith.mulf %6, %13 : vector<16x16x4xf32>
    %15 = vector.shape_cast %14 : vector<16x16x4xf32> to vector<16x64xf32>
    %c0_7 = arith.constant 0 : index
    %c0_8 = arith.constant 0 : index
    %16 = vector.load %arg4[%c0_7, %c0_8] : memref<16x64xf32, #tpu.memory_space<vmem>>, vector<16x64xf32>
    tpu.vector_store %arg4[%c0_7, %c0_8], %15 {strides = array<i32>} : memref<16x64xf32, #tpu.memory_space<vmem>>, vector<16x64xf32>,
    return
  }
  func.func @transform_0(%arg0: i32) -> (i32, i32) {
    %c0_i32 = arith.constant 0 : i32
    %c0_i32_0 = arith.constant 0 : i32
    return %arg0, %c0_i32 : i32, i32
  }
  func.func @transform_1(%arg0: i32) -> (i32, i32) {
    %c0_i32 = arith.constant 0 : i32
    %c0_i32_0 = arith.constant 0 : i32
    %c0_i32_1 = arith.constant 0 : i32
    return %c0_i32, %c0_i32_0 : i32, i32
  }
  func.func @transform_2(%arg0: i32) -> (i32, i32) {
    %c0_i32 = arith.constant 0 : i32
    %c0_i32_0 = arith.constant 0 : i32
    %c0_i32_1 = arith.constant 0 : i32
    return %c0_i32, %c0_i32_0 : i32, i32
  }
  func.func @transform_3(%arg0: i32) -> (i32, i32) {
    %c0_i32 = arith.constant 0 : i32
    %c0_i32_0 = arith.constant 0 : i32
    return %arg0, %c0_i32 : i32, i32
  }
}

</mosaic_0001>

<bundles_post_ra>
// kernel: deep_clustering_forward.5
= control target key start
LH: loop header
LB: loop body
LE: loop exit
PB: predicated region body
PF: predicated region fallthrough
CT: control target
= control target key end

     0   :  { %v61_v0 = vlaneseq  ;;  %v736_v4 = vmov 1983009808   ;;  %vm90_vm0 = vcmask 523264   ;;  %s927_s1 = inlined_call_operand.vmem [shape: f32[64,128], index: 1, kind: input, shape index: {}]   ;;  %s928_s3 = inlined_call_operand.vmem [shape: f32[32,256], index: 3, kind: input, shape index: {}]   ;;  %s929_s6 = inlined_call_operand.vmem [shape: f32[8,2,64], index: 6, kind: output, shape index: {}]   ;;  %s930_s2 = inlined_call_operand.vmem [shape: f32[64,128], index: 2, kind: input, shape index: {}]   ;;  %s931_s0 = inlined_call_operand.vmem [shape: f32[8,2,64], index: 0, kind: input, shape index: {}]   ;;  %s932_s4 = inlined_call_operand.vmem [shape: f32[1,128], index: 4, kind: input, shape index: {}]   ;;  %s933_s5 = inlined_call_operand.vmem [shape: f32[1,128], index: 5, kind: input, shape index: {}]  }
   0x1   :  { %v33_v1 = vld [vmem:[%s927_s1] sm:$0xff]  ;;  %v34_v2 = vld [vmem:[%s927_s1 + $0x8] sm:$0xff]  ;;  %v59_v5 = vunpack.c.l.s4 %v736_v4  ;;  %v35_v8 = vld [vmem:[%s927_s1 + $0x10] sm:$0xff] }
   0x2   :  { %v222_v3 = vld [vmem:[%s930_s2] sm:$0xff]  ;;  %v636_v6 = vpack.c.bf16 %v34_v2, %v33_v1  ;;  %v223_v7 = vld [vmem:[%s930_s2 + $0x8] sm:$0xff]  ;;  %v36_v9 = vld [vmem:[%s927_s1 + $0x18] sm:$0xff]  ;;  %v62_v10 = vshrl.u32 %v61_v0, 7 }
   0x3   :  { %v652_v11 = vpack.c.bf16 %v223_v7, %v222_v3  ;;  %v640_v12 = vpack.c.bf16 %v36_v9, %v35_v8  ;;  %v224_v13 = vld [vmem:[%s930_s2 + $0x10] sm:$0xff]  ;;  %v225_v14 = vld [vmem:[%s930_s2 + $0x18] sm:$0xff]  ;;  %v37_v15 = vld [vmem:[%s927_s1 + $0x20] sm:$0xff]  ;;  %v60_v16 = vunpack.c.0.s8 %v59_v5 }
   0x4   :  { %637 = vmatprep.subr.bf16.mxu0 %v636_v6  ;;  %v656_v17 = vpack.c.bf16 %v225_v14, %v224_v13  ;;  %v38_v18 = vld [vmem:[%s927_s1 + $0x28] sm:$0xff]  ;;  %v226_v19 = vld [vmem:[%s930_s2 + $0x20] sm:$0xff]  ;;  %v39_v21 = vld [vmem:[%s927_s1 + $0x30] sm:$0xff]  ;;  %v867_v14 = vmov 0.0  }
   0x5   :  { %v227_v20 = vld [vmem:[%s930_s2 + $0x28] sm:$0xff]  ;;  %653 = vmatprep.subr.bf16.mxu1 %v652_v11  ;;  %639 = vmatpush3.bf16.msra.mxu0 %v636_v6  ;;  %v40_v22 = vld [vmem:[%s927_s1 + $0x38] sm:$0xff]  ;;  %v817_v23 = vsub.s32 %v60_v16, %v62_v10  ;;  %v644_v24 = vpack.c.bf16 %v38_v18, %v37_v15  ;;  %v228_v25 = vld [vmem:[%s930_s2 + $0x30] sm:$0xff]  ;;  %v869_v15 = vmov 0.0  }
   0x6   :  { %655 = vmatpush3.bf16.msra.mxu1 %v652_v11  ;;  %641 = vmatprep.subr.bf16.mxu0 %v640_v12  ;;  %v229_v26 = vld [vmem:[%s930_s2 + $0x38] sm:$0xff]  ;;  %v25_v27 = vld [vmem:[%s931_s0] sm:$0x3]  ;;  %v26_v28 = vld [vmem:[%s931_s0 + $0x2] sm:$0x3]  ;;  %v660_v29 = vpack.c.bf16 %v227_v20, %v226_v19  ;;  %v648_v41 = vpack.c.bf16 %v40_v22, %v39_v21 }
   0x7   :  { %657 = vmatprep.subr.bf16.mxu1 %v656_v17  ;;  %v27_v30 = vld [vmem:[%s931_s0 + $0x4] sm:$0x3]  ;;  %v28_v31 = vld [vmem:[%s931_s0 + $0x6] sm:$0x3]  ;;  %v56_v32 = vcombine.low %v25_v27, %v26_v28  ;;  %v29_v33 = vld [vmem:[%s931_s0 + $0x8] sm:$0x3]  ;;  %v664_v43 = vpack.c.bf16 %v229_v26, %v228_v25 }
   0x8   :  { %v57_v34 = vcombine.low %v27_v30, %v28_v31  ;;  %v30_v35 = vld [vmem:[%s931_s0 + $0xa] sm:$0x3]  ;;  %v31_v36 = vld [vmem:[%s931_s0 + $0xc] sm:$0x3]  ;;  %v32_v37 = vld [vmem:[%s931_s0 + $0xe] sm:$0x3] }
   0x9   :  { %643 = vmatpush3.bf16.msra.mxu0 %v640_v12  ;;  %v64_v38 = vrot.slane %v56_v32, %v817_v23  ;;  %v73_v39 = vcombine.low %v29_v33, %v30_v35  ;;  %v74_v40 = vcombine.low %v31_v36, %v32_v37  ;;  %v554_v48 = vld [vmem:[%s932_s4] ss:$0 sm:$0xff]  ;;  %s871_s4 = smov 0  }
   0xa   :  { %659 = vmatpush3.bf16.msra.mxu1 %v656_v17  ;;  %645 = vmatprep.subr.bf16.mxu0 %v644_v24  ;;  %v71_v42 = vrot.slane %v57_v34, %v817_v23  ;;  %v561_v49 = vld [vmem:[%s933_s5] ss:$0 sm:$0xff] }
   0xb   :  { %661 = vmatprep.subr.bf16.mxu1 %v660_v29  ;;  %v81_v45 = vrot.slane %v73_v39, %v817_v23  ;;  %v88_v46 = vrot.slane %v74_v40, %v817_v23 }
   0xc   :  { %v72_v44 = vcombine.low %v64_v38, %v71_v42 }
   0xd   :  { %647 = vmatpush3.bf16.msra.mxu0 %v644_v24  ;;  %v89_v47 = vcombine.low %v81_v45, %v88_v46 }
   0xe   :  { %663 = vmatpush3.bf16.msra.mxu1 %v660_v29  ;;  %649 = vmatprep.subr.bf16.mxu0 %v648_v41 }
   0xf   :  { %665 = vmatprep.subr.bf16.mxu1 %v664_v43  ;;  %614 = vmatprep.mubr.msk.f32.mxu0 %vm90_vm0, %v72_v44 }
  0x10   :  { %633 = vmatprep.mubr.msk.f32.mxu1 %vm90_vm0, %v72_v44 }
  0x11   :  { %651 = vmatpush3.bf16.msra.mxu0 %v648_v41 }
  0x12   :  { %667 = vmatpush3.bf16.msra.mxu1 %v664_v43 }
  0x14   :  { %615 = vmatmul.mubr.msk.f32.vlgmr.msra.gmra.mrb[0].mxu0 %vm90_vm0, %v89_v47 }
  0x15   :  { %634 = vmatmul.mubr.msk.f32.vlgmr.msra.gmra.mrb[0].mxu1 %vm90_vm0, %v89_v47 }
  0xe7   :  { %v616_v50 = vpop.f32.mrb[0].mxu0 }
  0xe8   :  { %v167_v51 = vadd.f32 %v616_v50, %v554_v48  ;;  %v635_v52 = vpop.f32.mrb[0].mxu1  ;;  %v161_v53 = vpop.f32.mrb[1].mxu0 }
  0xe9   :  { %v309_v54 = vadd.f32 %v635_v52, %v561_v49  ;;  %v162_v55 = vadd.f32 %v554_v48, %v161_v53  ;;  %v303_v56 = vpop.f32.mrb[1].mxu1 }
  0xea   :  { %v189_v57 = vcombine.high %v167_v51, %v167_v51  ;;  %v196_v58 = vrot.slane %v167_v51, %v817_v23  ;;  %559 = vst.sshfl [vmem:[#allocation2 + $0x10] sm:$0x3 pattern:$0x76325410] %v167_v51  ;;  %v304_v59 = vadd.f32 %v561_v49, %v303_v56 }
  0xeb   :  { %v331_v60 = vcombine.high %v309_v54, %v309_v54  ;;  %v338_v61 = vrot.slane %v309_v54, %v817_v23  ;;  %566 = vst.sshfl [vmem:[#allocation2 + $0x12] sm:$0x3 pattern:$0x76325410] %v309_v54  ;;  %v172_v62 = vcombine.high %v162_v55, %v162_v55  ;;  %v179_v63 = vrot.slane %v162_v55, %v817_v23 }
  0xec   :  { %557 = vst.sshfl [vmem:[#allocation2] sm:$0x3 pattern:$0x76325410] %v162_v55  ;;  %v203_v0 = vrot.slane %v189_v57, %v817_v23  ;;  %v204_v1 = vcombine.high %v196_v58, %v196_v58  ;;  %v314_v2 = vcombine.high %v304_v59, %v304_v59  ;;  %v321_v3 = vrot.slane %v304_v59, %v817_v23 }
  0xed   :  { %560 = vst.sshfl [vmem:[#allocation2 + $0x18] sm:$0x3 pattern:$0x76325410] %v189_v57  ;;  %v345_v4 = vrot.slane %v331_v60, %v817_v23  ;;  %v346_v5 = vcombine.high %v338_v61, %v338_v61  ;;  %v186_v6 = vrot.slane %v172_v62, %v817_v23  ;;  %v187_v7 = vcombine.high %v179_v63, %v179_v63 }
  0xee   :  { %564 = vst.sshfl [vmem:[#allocation2 + $0x2] sm:$0x3 pattern:$0x76325410] %v304_v59  ;;  %v205_v8 = vcombine.high %v203_v0, %v203_v0  ;;  %219 = vst [vmem:[#allocation2 + $0x14] sm:$0x3] %v204_v1  ;;  %v328_v9 = vrot.slane %v314_v2, %v817_v23  ;;  %v329_v10 = vcombine.high %v321_v3, %v321_v3 }
  0xef   :  { %567 = vst.sshfl [vmem:[#allocation2 + $0x1a] sm:$0x3 pattern:$0x76325410] %v331_v60  ;;  %v347_v11 = vcombine.high %v345_v4, %v345_v4  ;;  %361 = vst [vmem:[#allocation2 + $0x16] sm:$0x3] %v346_v5  ;;  %v188_v12 = vcombine.high %v186_v6, %v186_v6 }
  0xf0   :  { %558 = vst.sshfl [vmem:[#allocation2 + $0x8] sm:$0x3 pattern:$0x76325410] %v172_v62  ;;  %215 = vst [vmem:[#allocation2 + $0x4] sm:$0x3] %v187_v7  ;;  %v330_v13 = vcombine.high %v328_v9, %v328_v9 }
  0xf1   :  { %565 = vst.sshfl [vmem:[#allocation2 + $0xa] sm:$0x3 pattern:$0x76325410] %v314_v2  ;;  %221 = vst [vmem:[#allocation2 + $0x1c] sm:$0x3] %v205_v8 }
  0xf2   :  { %357 = vst [vmem:[#allocation2 + $0x6] sm:$0x3] %v329_v10  ;;  %363 = vst [vmem:[#allocation2 + $0x1e] sm:$0x3] %v347_v11 }
  0xf3   :  { %217 = vst [vmem:[#allocation2 + $0xc] sm:$0x3] %v188_v12  ;;  %359 = vst [vmem:[#allocation2 + $0xe] sm:$0x3] %v330_v13 }
  0xf4 LB: > { %v373_v16 = vld [vmem:[%s928_s3 + $0x8] sm:$0xff]  ;;  %v375_v17 = vld [vmem:[%s928_s3 + $0x18] sm:$0xff]  ;;  %v372_v18 = vld [vmem:[%s928_s3] sm:$0xff]  ;;  %v737_v24 = vmov 0.0   ;;  %s738_s1 = smov 32   ;;  %vm383_vm1 = vcmask 261120   ;;  %s734_s4 = sphi %s871_s4, %s369_s4   ;;  %v730_v15 = vphi %v869_v15, %v513_v15   ;;  %v726_v14 = vphi %v867_v14, %v507_v14  }
  0xf5   : > { %v668_v19 = vpack.c.bf16 %v375_v17, %v373_v16  ;;  %v374_v20 = vld [vmem:[%s928_s3 + $0x10] sm:$0xff]  ;;  %v377_v21 = vld [vmem:[%s928_s3 + $0x28] sm:$0xff]  ;;  %v379_v22 = vld [vmem:[%s928_s3 + $0x38] sm:$0xff]  ;;  %450 = vmatprep.mubr.f32.mxu0 %v737_v24  ;;  %381 = vrot.lane.b32.xlu0 %v730_v15, %s738_s1  ;;  %s462_s12 = ssub.s32 7, %s734_s4  ;;  %s576_s14 = sshll.u32 %s734_s4, 2  ;;  %vm488_vm2 = vcmask 1041408  }
  0xf6   : > { %v670_v25 = vpack.c.bf16 %v374_v20, %v372_v18  ;;  %v672_v26 = vpack.c.bf16 %v379_v22, %v377_v21  ;;  %v376_v27 = vld [vmem:[%s928_s3 + $0x20] sm:$0xff]  ;;  %v378_v28 = vld [vmem:[%s928_s3 + $0x30] sm:$0xff]  ;;  %s577_s13 = sshll.u32 %s462_s12, 2  ;;  %s459_s16 = scalar_lea.vmem [#allocation2], %s576_s14  ;;  %vm522_vm3 = vcmask 254976   ;;  %vm529_vm4 = vcmask 519426  }
  0xf7   : > { %669 = vmatprep.subr.bf16.mxu0 %v668_v19  ;;  %v674_v29 = vpack.c.bf16 %v378_v28, %v376_v27  ;;  %s465_s15 = scalar_lea.vmem [#allocation2], %s577_s13  ;;  %s739_s17 = smov 64  }
  0xf8   : > { %671 = vmatpush1.bf16.msra.mxu0 %v670_v25  ;;  %s574_s18 = sshll.u32 %s734_s4, 1  ;;  %s575_s0 = sshll.u32 %s462_s12, 1 }
  0xf9   : > { %673 = vmatprep.subr.bf16.mxu0 %v672_v26  ;;  %s521_s21 = scalar_lea.vmem %s929_s6, %s574_s18  ;;  %s528_s23 = scalar_lea.vmem %s929_s6, %s575_s0 }
  0xfa   : > { %v466_v34 = vld [vmem:[%s465_s15 + $0x2] sm:$0x3]  ;;  %v460_v37 = vld [vmem:[%s459_s16] sm:$0x3]  ;;  %s369_s4 = sadd.s32 1, %s734_s4  }
  0xfb   : > { %p366_p0 = scmp.ge.s32.totalorder %s369_s4, 8  }
  0xfc   : > { %675 = vmatpush1.bf16.msra.mxu0 %v674_v29 }
 0x167   : > { %v382_v30 = vpop.permute.xlu0 %381 }
 0x168   : > { %568 = vmatmul.mubr.msk.f32.vlgmr.msra.gmra.mrb[0].mxu0 %vm383_vm1, %v382_v30 }
 0x23b   : > { %v452_v31 = vpop.f32.mrb[0].mxu0 }
 0x23c   : > { %v454_v32 = vpop.f32.mrb[1].mxu0  ;;  %v461_v39 = vadd.f32 %v460_v37, %v452_v31 }
 0x23d   : > { %v474_v33 = vrot.slane %v454_v32, %v817_v23 }
 0x23f   : > { %v475_v35 = vcombine.high %v474_v33, %v474_v33 }
 0x241   : > { %v477_v36 = vadd.f32 %v475_v35, %v466_v34 }
 0x243   : > { %v479_v38 = vcombine.low %v477_v36, %v477_v36 }
 0x245   : > { %v486_v40 = vrot.slane %v479_v38, %v817_v23 }
 0x247   : > { %v489_v41 = vsel %vm488_vm2, %v461_v39, %v486_v40 }
 0x248   : > { %704 = vtanh.f32 %v489_v41  ;;  %v573_v43 = vmul.f32 -1.442695, %v489_v41 }
 0x24a   : > { %706 = vpow2.f32 %v573_v43 }
 0x252   : > { %v705_v42 = vpop.eup %704 }
 0x253   : > { %499 = vrot.lane.b32.xlu0 %v705_v42, %s739_s17 }
 0x254   : > { %v707_v44 = vpop.eup %706 }
 0x255   : > { %v493_v45 = vadd.f32 1.0, %v707_v44 }
 0x257   : > { %708 = vrcp.f32 %v493_v45 }
 0x261   : > { %v709_v46 = vpop.eup %708 }
 0x262   : > { %v497_v49 = vmul.f32 %v726_v14, %v709_v46 }
 0x2c5   : > { %v500_v47 = vpop.permute.xlu0 %499 }
 0x2c6   : > { %v502_v48 = vmul.f32 %v709_v46, %v500_v47 }
 0x2c8   : > { %504 = vrot.lane.b32.xlu1 %v502_v48, %s738_s1 }
 0x33a   : > { %v505_v50 = vpop.permute.xlu1 %504 }
 0x33b   : > { %v507_v14 = vadd.f32 %v505_v50, %v497_v49  }
 0x33d   : > { %710 = vtanh.f32 %v507_v14 }
 0x347   : > { %v711_v51 = vpop.eup %710 }
 0x348   : > { %510 = vrot.lane.b32.xlu1 %v711_v51, %s739_s17 }
 0x3ba   : > { %v511_v52 = vpop.permute.xlu1 %510 }
 0x3bb   : > { %v513_v15 = vmul.f32 %v709_v46, %v511_v52  }
 0x3bd   : > { %524 = vrot.lane.b32.xlu1 %v513_v15, %s739_s17  ;;  %517 = vrot.lane.b32.xlu0 %v513_v15, %s738_s1 }
 0x42b   :  { %368 = sbr.rel (!%p366_p0) target bundleno = 244 (0xf4), region = 56 }
 0x42f   : > { %v525_v53 = vpop.permute.xlu1 %524  ;;  %v518_v54 = vpop.permute.xlu0 %517 }
 0x430   : > { %523 = vst.msk [vmem:[%s521_s21] sm:$0x3] %vm522_vm3, %v518_v54 }
 0x431   : > { %530 = vst.msk [vmem:[%s528_s23 - $0x2] sm:$0xc] %vm529_vm4, %v525_v53 }

// kernel: deep_clustering_forward.4
= control target key start
LH: loop header
LB: loop body
LE: loop exit
PB: predicated region body
PF: predicated region fallthrough
CT: control target
= control target key end

     0   :  { %11 = vsyncpa [#allocation4], 0  ;;  %s1059_s0 = inlined_call_operand.vmem [shape: f32[8,2,16], index: 0, kind: input, shape index: {}]   ;;  %s1060_s1 = inlined_call_operand.hbm [shape: f32[16,128], index: 1, kind: input, shape index: {}]   ;;  %s1061_s2 = inlined_call_operand.hbm [shape: f32[16,128], index: 2, kind: input, shape index: {}]   ;;  %s1062_s3 = inlined_call_operand.hbm [shape: f32[32,256], index: 3, kind: input, shape index: {}]   ;;  %s1063_s4 = inlined_call_operand.hbm [shape: f32[1,128], index: 4, kind: input, shape index: {}]   ;;  %s1064_s5 = inlined_call_operand.hbm [shape: f32[1,128], index: 5, kind: input, shape index: {}]   ;;  %s1065_s6 = inlined_call_operand.vmem [shape: f32[8,2,64], index: 6, kind: output, shape index: {}]  }
   0x1   :  { %12 = vsyncpa [#allocation6], 0 }
   0x2   :  { %13 = vsyncpa [#allocation9], 0  ;;  %s856_s21 = smov [#allocation5]   ;;  %s857_s23 = smov [#allocation8]  }
   0x3   :  { %s33_s22 = sshll.u32 %s856_s21, 4  ;;  %s58_s24 = sshll.u32 %s857_s23, 4  ;;  %s34_s22 = int_to_ptr.vmem [resolvable:$true] %s33_s22  ;;  %s904_s24 = int_to_ptr.vmem [resolvable:$true] %s58_s24 }
   0x4   :  { %s716_s27 = scalar_lea.hbm %s1061_s2, 256 }
   0x5   :  { %p717_p0 = scmp.ne.s32.totalorder %s1061_s2, %s716_s27  ;;  %p720_p1 = scmp.lt.u32.totalorder %s716_s27, %s1061_s2 }
   0x7   :  { %p722_p2 = pnand %p720_p1, %p717_p0 }
   0x9   :  { %725 = shalt.err (!%p722_p2)
}
   0xa   :  { %s726_s8 = scalar_lea.vmem %s34_s22, 256  ;;  %p731_p4 = scmp.lt.s32.totalorder %s34_s22, %s34_s22 }
   0xb   :  { %p727_p3 = scmp.ne.s32.totalorder %s34_s22, %s726_s8  ;;  %p732_p5 = scmp.lt.s32.totalorder %s726_s8, %s726_s8 }
   0xd   :  { %p733_p6 = por %p732_p5, %p731_p4 }
   0xf   :  { %p734_p7 = pnand %p733_p6, %p727_p3 }
  0x11   :  { %737 = shalt.err (!%p734_p7)
}
  0x12   :  { %s858_s9 = smov 128   ;;  %s859_s10 = smov 8  }
  0x13   :  { %39 = dma.hbm_to_vmem [thread:$0]  %s1061_s2, 256, %s34_s22, [#allocation6], %s858_s9, %s858_s9, %s859_s10  }
  0x14   :  { %s738_s15 = scalar_lea.hbm %s1063_s4, 16 }
  0x15   :  { %p739_p8 = scmp.ne.s32.totalorder %s1063_s4, %s738_s15  ;;  %p742_p9 = scmp.lt.u32.totalorder %s738_s15, %s1063_s4 }
  0x17   :  { %p744_p10 = pnand %p742_p9, %p739_p8 }
  0x19   :  { %747 = shalt.err (!%p744_p10)
}
  0x1a   :  { %s748_s20 = scalar_lea.vmem %s904_s24, 16  ;;  %s752_s2 = scalar_lea.vmem %s904_s24, 32 }
  0x1b   :  { %p749_p11 = scmp.ne.s32.totalorder %s904_s24, %s748_s20  ;;  %p753_p12 = scmp.lt.s32.totalorder %s904_s24, %s904_s24 }
  0x1c   :  { %p754_p13 = scmp.lt.s32.totalorder %s752_s2, %s748_s20 }
  0x1e   :  { %p755_p0 = por %p754_p13, %p753_p12 }
  0x20   :  { %p756_p1 = pnand %p755_p0, %p749_p11 }
  0x22   :  { %759 = shalt.err (!%p756_p1)
}
  0x23   :  { %61 = dma.hbm_to_vmem [thread:$0]  %s1063_s4, 16, %s904_s24, [#allocation9]  }
  0x24   :  { %s860_s23 = smov [#allocation3]   ;;  %s861_s26 = smov [#allocation7]  }
  0x25   :  { %s21_s25 = sshll.u32 %s860_s23, 4  ;;  %s45_s27 = sshll.u32 %s861_s26, 4  ;;  %s22_s25 = int_to_ptr.vmem [resolvable:$true] %s21_s25  ;;  %s939_s27 = int_to_ptr.vmem [resolvable:$true] %s45_s27 }
  0x26   :  { %s760_s30 = scalar_lea.hbm %s1060_s1, 256 }
  0x27   :  { %p761_p2 = scmp.ne.s32.totalorder %s1060_s1, %s760_s30  ;;  %p764_p3 = scmp.lt.u32.totalorder %s760_s30, %s1060_s1 }
  0x29   :  { %p766_p4 = pnand %p764_p3, %p761_p2 }
  0x2b   :  { %769 = shalt.err (!%p766_p4)
}
  0x2c   :  { %s770_s4 = scalar_lea.vmem %s22_s25, 256  ;;  %p775_p6 = scmp.lt.s32.totalorder %s22_s25, %s22_s25 }
  0x2d   :  { %p771_p5 = scmp.ne.s32.totalorder %s22_s25, %s770_s4  ;;  %p776_p7 = scmp.lt.s32.totalorder %s770_s4, %s770_s4 }
  0x2f   :  { %p777_p8 = por %p776_p7, %p775_p6 }
  0x31   :  { %p778_p9 = pnand %p777_p8, %p771_p5 }
  0x33   :  { %781 = shalt.err (!%p778_p9)
}
  0x34   :  { %27 = dma.hbm_to_vmem [thread:$0]  %s1060_s1, 256, %s22_s25, [#allocation4], %s858_s9, %s858_s9, %s859_s10  }
  0x35   :  { %s782_s16 = scalar_lea.hbm %s1062_s3, 1024 }
  0x36   :  { %p783_p10 = scmp.ne.s32.totalorder %s1062_s3, %s782_s16  ;;  %p786_p11 = scmp.lt.u32.totalorder %s782_s16, %s1062_s3 }
  0x38   :  { %p788_p12 = pnand %p786_p11, %p783_p10 }
  0x3a   :  { %791 = shalt.err (!%p788_p12)
}
  0x3b   :  { %s792_s2 = scalar_lea.vmem %s939_s27, 1024  ;;  %p797_p0 = scmp.lt.s32.totalorder %s939_s27, %s939_s27 }
  0x3c   :  { %p793_p13 = scmp.ne.s32.totalorder %s939_s27, %s792_s2  ;;  %p798_p1 = scmp.lt.s32.totalorder %s792_s2, %s792_s2 }
  0x3e   :  { %p799_p2 = por %p798_p1, %p797_p0 }
  0x40   :  { %p800_p3 = pnand %p799_p2, %p793_p13 }
  0x42   :  { %803 = shalt.err (!%p800_p3)
}
  0x43   :  { %s862_s1 = smov 256   ;;  %s863_s9 = smov 16  }
  0x44   :  { %51 = dma.hbm_to_vmem [thread:$0]  %s1062_s3, 1024, %s939_s27, [#allocation6], %s862_s1, %s862_s1, %s863_s9  }
  0x45   :  { %s864_s22 = smov [#allocation10]   ;;  %s804_s28 = scalar_lea.hbm %s1064_s5, 16 }
  0x46   :  { %s68_s23 = sshll.u32 %s864_s22, 4  ;;  %p805_p4 = scmp.ne.s32.totalorder %s1064_s5, %s804_s28  ;;  %s69_s23 = int_to_ptr.vmem [resolvable:$true] %s68_s23 }
  0x47   :  { %p808_p5 = scmp.lt.u32.totalorder %s804_s28, %s1064_s5 }
  0x49   :  { %p810_p6 = pnand %p808_p5, %p805_p4 }
  0x4b   :  { %813 = shalt.err (!%p810_p6)
}
  0x4c   :  { %s814_s11 = scalar_lea.vmem %s69_s23, 16  ;;  %s818_s3 = scalar_lea.vmem %s69_s23, 32 }
  0x4d   :  { %p815_p7 = scmp.ne.s32.totalorder %s69_s23, %s814_s11  ;;  %p819_p8 = scmp.lt.s32.totalorder %s69_s23, %s69_s23 }
  0x4e   :  { %p820_p9 = scmp.lt.s32.totalorder %s818_s3, %s814_s11 }
  0x50   :  { %p821_p10 = por %p820_p9, %p819_p8 }
  0x52   :  { %p822_p11 = pnand %p821_p10, %p815_p7 }
  0x54   :  { %825 = shalt.err (!%p822_p11)
}
  0x55   :  { %71 = dma.hbm_to_vmem [thread:$0]  %s1064_s5, 16, %s69_s23, [#allocation9]  }
  0x56   :  { %838 = dma.done.wait [#allocation4], 256  }
  0x57   :  { %839 = vsyncadd [#allocation4], 4294967040 }
  0x58   :  { %840 = dma.done.wait [#allocation6], 1280  }
  0x59   :  { %841 = vsyncadd [#allocation6], 4294966016 }
  0x5a   :  { %842 = dma.done.wait [#allocation9], 32  }
  0x5b   :  { %843 = vsyncadd [#allocation9], 4294967264  ;;  %v119_v0 = vlaneseq  ;;  %v865_v1 = vmov 1983009808   ;;  %v97_v5 = vld [vmem:[#allocation3] sm:$0xff]  ;;  %v98_v6 = vld [vmem:[#allocation3 + $0x8] sm:$0xff] }
  0x5c   :  { %v117_v2 = vunpack.c.l.s4 %v865_v1  ;;  %v280_v7 = vld [vmem:[#allocation5] sm:$0xff]  ;;  %v655_v9 = vpack.c.bf16 %v98_v6, %v97_v5  ;;  %v281_v10 = vld [vmem:[#allocation5 + $0x8] sm:$0xff]  ;;  %v89_v11 = vld [vmem:[%s1059_s0] sm:$0x3]  ;;  %vm148_vm0 = vcmask 130048   ;;  %v1023_v60 = vmov 0.0  }
  0x5d   :  { %v120_v4 = vshrl.u32 %v119_v0, 7  ;;  %v90_v12 = vld [vmem:[%s1059_s0 + $0x2] sm:$0x3]  ;;  %v659_v13 = vpack.c.bf16 %v281_v10, %v280_v7  ;;  %v91_v14 = vld [vmem:[%s1059_s0 + $0x4] sm:$0x3]  ;;  %v1025_v61 = vmov 0.0  }
  0x5e   :  { %v118_v3 = vunpack.c.0.s8 %v117_v2  ;;  %v92_v15 = vld [vmem:[%s1059_s0 + $0x6] sm:$0x3]  ;;  %v114_v16 = vcombine.low %v89_v11, %v90_v12  ;;  %v93_v17 = vld [vmem:[%s1059_s0 + $0x8] sm:$0x3]  ;;  %656 = vmatprep.subr.bf16.mxu0 %v655_v9  ;;  %v94_v19 = vld [vmem:[%s1059_s0 + $0xa] sm:$0x3] }
  0x5f   :  { %v115_v18 = vcombine.low %v91_v14, %v92_v15  ;;  %v95_v20 = vld [vmem:[%s1059_s0 + $0xc] sm:$0x3]  ;;  %v96_v21 = vld [vmem:[%s1059_s0 + $0xe] sm:$0x3]  ;;  %660 = vmatprep.subr.bf16.mxu1 %v659_v13  ;;  %658 = vmatpush3.bf16.msra.mxu0 %v655_v9  ;;  %v131_v23 = vcombine.low %v93_v17, %v94_v19  ;;  %v609_v30 = vld [vmem:[#allocation8] ss:$0 sm:$0xff] }
  0x60   :  { %v985_v8 = vsub.s32 %v118_v3, %v120_v4  ;;  %v132_v24 = vcombine.low %v95_v20, %v96_v21  ;;  %662 = vmatpush3.bf16.msra.mxu1 %v659_v13  ;;  %v616_v31 = vld [vmem:[#allocation10] ss:$0 sm:$0xff]  ;;  %s1027_s0 = smov 0  }
  0x62   :  { %v122_v22 = vrot.slane %v114_v16, %v985_v8  ;;  %v129_v25 = vrot.slane %v115_v18, %v985_v8  ;;  %v139_v26 = vrot.slane %v131_v23, %v985_v8  ;;  %v146_v27 = vrot.slane %v132_v24, %v985_v8 }
  0x64   :  { %v130_v28 = vcombine.low %v122_v22, %v129_v25  ;;  %v147_v29 = vcombine.low %v139_v26, %v146_v27 }
  0x66   :  { %645 = vmatprep.mubr.msk.f32.mxu0 %vm148_vm0, %v130_v28  ;;  %652 = vmatprep.mubr.msk.f32.mxu1 %vm148_vm0, %v130_v28 }
  0x67   :  { %646 = vmatmul.mubr.msk.f32.vlgmr.msra.gmra.mrb[0].mxu0 %vm148_vm0, %v147_v29  ;;  %653 = vmatmul.mubr.msk.f32.vlgmr.msra.gmra.mrb[0].mxu1 %vm148_vm0, %v147_v29 }
 0x13a   :  { %v647_v32 = vpop.f32.mrb[0].mxu0  ;;  %v654_v33 = vpop.f32.mrb[0].mxu1 }
 0x13b   :  { %v225_v34 = vadd.f32 %v647_v32, %v609_v30  ;;  %v361_v35 = vadd.f32 %v654_v33, %v616_v31  ;;  %v219_v36 = vpop.f32.mrb[1].mxu0  ;;  %v355_v37 = vpop.f32.mrb[1].mxu1 }
 0x13c   :  { %v220_v38 = vadd.f32 %v609_v30, %v219_v36  ;;  %v356_v39 = vadd.f32 %v616_v31, %v355_v37 }
 0x13d   :  { %v247_v40 = vcombine.high %v225_v34, %v225_v34  ;;  %v254_v41 = vrot.slane %v225_v34, %v985_v8  ;;  %614 = vst.sshfl [vmem:[#allocation2 + $0x10] sm:$0x3 pattern:$0x76325410] %v225_v34  ;;  %v383_v42 = vcombine.high %v361_v35, %v361_v35  ;;  %v390_v43 = vrot.slane %v361_v35, %v985_v8 }
 0x13e   :  { %621 = vst.sshfl [vmem:[#allocation2 + $0x12] sm:$0x3 pattern:$0x76325410] %v361_v35  ;;  %v230_v44 = vcombine.high %v220_v38, %v220_v38  ;;  %v237_v45 = vrot.slane %v220_v38, %v985_v8  ;;  %v366_v46 = vcombine.high %v356_v39, %v356_v39  ;;  %v373_v47 = vrot.slane %v356_v39, %v985_v8 }
 0x13f   :  { %612 = vst.sshfl [vmem:[#allocation2] sm:$0x3 pattern:$0x76325410] %v220_v38  ;;  %v261_v48 = vrot.slane %v247_v40, %v985_v8  ;;  %v262_v49 = vcombine.high %v254_v41, %v254_v41  ;;  %v397_v50 = vrot.slane %v383_v42, %v985_v8  ;;  %v398_v51 = vcombine.high %v390_v43, %v390_v43 }
 0x140   :  { %619 = vst.sshfl [vmem:[#allocation2 + $0x2] sm:$0x3 pattern:$0x76325410] %v356_v39  ;;  %v244_v52 = vrot.slane %v230_v44, %v985_v8  ;;  %v245_v53 = vcombine.high %v237_v45, %v237_v45  ;;  %v380_v54 = vrot.slane %v366_v46, %v985_v8  ;;  %v381_v55 = vcombine.high %v373_v47, %v373_v47 }
 0x141   :  { %615 = vst.sshfl [vmem:[#allocation2 + $0x18] sm:$0x3 pattern:$0x76325410] %v247_v40  ;;  %v263_v56 = vcombine.high %v261_v48, %v261_v48  ;;  %277 = vst [vmem:[#allocation2 + $0x14] sm:$0x3] %v262_v49  ;;  %v399_v57 = vcombine.high %v397_v50, %v397_v50 }
 0x142   :  { %622 = vst.sshfl [vmem:[#allocation2 + $0x1a] sm:$0x3 pattern:$0x76325410] %v383_v42  ;;  %413 = vst [vmem:[#allocation2 + $0x16] sm:$0x3] %v398_v51  ;;  %v246_v58 = vcombine.high %v244_v52, %v244_v52  ;;  %v382_v59 = vcombine.high %v380_v54, %v380_v54 }
 0x143   :  { %613 = vst.sshfl [vmem:[#allocation2 + $0x8] sm:$0x3 pattern:$0x76325410] %v230_v44  ;;  %273 = vst [vmem:[#allocation2 + $0x4] sm:$0x3] %v245_v53 }
 0x144   :  { %620 = vst.sshfl [vmem:[#allocation2 + $0xa] sm:$0x3 pattern:$0x76325410] %v366_v46  ;;  %409 = vst [vmem:[#allocation2 + $0x6] sm:$0x3] %v381_v55 }
 0x145   :  { %279 = vst [vmem:[#allocation2 + $0x1c] sm:$0x3] %v263_v56  ;;  %415 = vst [vmem:[#allocation2 + $0x1e] sm:$0x3] %v399_v57 }
 0x146   :  { %275 = vst [vmem:[#allocation2 + $0xc] sm:$0x3] %v246_v58  ;;  %411 = vst [vmem:[#allocation2 + $0xe] sm:$0x3] %v382_v59 }
 0x147 LB: > { %v425_v62 = vld [vmem:[#allocation7 + $0x8] sm:$0xff]  ;;  %v427_v63 = vld [vmem:[#allocation7 + $0x18] sm:$0xff]  ;;  %v424_v0 = vld [vmem:[#allocation7] sm:$0xff]  ;;  %v866_v5 = vmov 0.0   ;;  %s867_s22 = smov 32   ;;  %vm435_vm1 = vcmask 261120   ;;  %s854_s0 = sphi %s1027_s0, %s421_s0   ;;  %v850_v61 = vphi %v1025_v61, %v565_v61   ;;  %v846_v60 = vphi %v1023_v60, %v559_v60  }
 0x148   : > { %v663_v1 = vpack.c.bf16 %v427_v63, %v425_v62  ;;  %v426_v2 = vld [vmem:[#allocation7 + $0x10] sm:$0xff]  ;;  %v429_v3 = vld [vmem:[#allocation7 + $0x28] sm:$0xff]  ;;  %v431_v4 = vld [vmem:[#allocation7 + $0x38] sm:$0xff]  ;;  %502 = vmatprep.mubr.f32.mxu0 %v866_v5  ;;  %433 = vrot.lane.b32.xlu0 %v850_v61, %s867_s22  ;;  %s514_s23 = ssub.s32 7, %s854_s0  ;;  %s631_s26 = sshll.u32 %s854_s0, 2  ;;  %vm540_vm2 = vcmask 1041408  }
 0x149   : > { %v665_v6 = vpack.c.bf16 %v426_v2, %v424_v0  ;;  %v667_v7 = vpack.c.bf16 %v431_v4, %v429_v3  ;;  %v428_v9 = vld [vmem:[#allocation7 + $0x20] sm:$0xff]  ;;  %v430_v10 = vld [vmem:[#allocation7 + $0x30] sm:$0xff]  ;;  %s632_s25 = sshll.u32 %s514_s23, 2  ;;  %s511_s29 = scalar_lea.vmem [#allocation2], %s631_s26  ;;  %vm574_vm3 = vcmask 254976   ;;  %vm581_vm4 = vcmask 519426  }
 0x14a   : > { %664 = vmatprep.subr.bf16.mxu0 %v663_v1  ;;  %v669_v11 = vpack.c.bf16 %v430_v10, %v428_v9  ;;  %s517_s28 = scalar_lea.vmem [#allocation2], %s632_s25  ;;  %s868_s30 = smov 64  }
 0x14b   : > { %666 = vmatpush1.bf16.msra.mxu0 %v665_v6  ;;  %s629_s7 = sshll.u32 %s854_s0, 1  ;;  %s630_s8 = sshll.u32 %s514_s23, 1 }
 0x14c   : > { %668 = vmatprep.subr.bf16.mxu0 %v667_v7  ;;  %s573_s27 = scalar_lea.vmem %s1065_s6, %s629_s7  ;;  %s580_s5 = scalar_lea.vmem %s1065_s6, %s630_s8 }
 0x14d   : > { %v518_v16 = vld [vmem:[%s517_s28 + $0x2] sm:$0x3]  ;;  %v512_v19 = vld [vmem:[%s511_s29] sm:$0x3]  ;;  %s421_s0 = sadd.s32 1, %s854_s0  }
 0x14e   : > { %p418_p12 = scmp.ge.s32.totalorder %s421_s0, 8  }
 0x14f   : > { %670 = vmatpush1.bf16.msra.mxu0 %v669_v11 }
 0x1ba   : > { %v434_v12 = vpop.permute.xlu0 %433 }
 0x1bb   : > { %623 = vmatmul.mubr.msk.f32.vlgmr.msra.gmra.mrb[0].mxu0 %vm435_vm1, %v434_v12 }
 0x28e   : > { %v504_v13 = vpop.f32.mrb[0].mxu0 }
 0x28f   : > { %v506_v14 = vpop.f32.mrb[1].mxu0  ;;  %v513_v21 = vadd.f32 %v512_v19, %v504_v13 }
 0x290   : > { %v526_v15 = vrot.slane %v506_v14, %v985_v8 }
 0x292   : > { %v527_v17 = vcombine.high %v526_v15, %v526_v15 }
 0x294   : > { %v529_v18 = vadd.f32 %v527_v17, %v518_v16 }
 0x296   : > { %v531_v20 = vcombine.low %v529_v18, %v529_v18 }
 0x298   : > { %v538_v22 = vrot.slane %v531_v20, %v985_v8 }
 0x29a   : > { %v541_v23 = vsel %vm540_vm2, %v513_v21, %v538_v22 }
 0x29b   : > { %708 = vtanh.f32 %v541_v23  ;;  %v628_v25 = vmul.f32 -1.442695, %v541_v23 }
 0x29d   : > { %710 = vpow2.f32 %v628_v25 }
 0x2a5   : > { %v709_v24 = vpop.eup %708 }
 0x2a6   : > { %551 = vrot.lane.b32.xlu0 %v709_v24, %s868_s30 }
 0x2a7   : > { %v711_v26 = vpop.eup %710 }
 0x2a8   : > { %v545_v27 = vadd.f32 1.0, %v711_v26 }
 0x2aa   : > { %712 = vrcp.f32 %v545_v27 }
 0x2b4   : > { %v713_v28 = vpop.eup %712 }
 0x2b5   : > { %v549_v31 = vmul.f32 %v846_v60, %v713_v28 }
 0x318   : > { %v552_v29 = vpop.permute.xlu0 %551 }
 0x319   : > { %v554_v30 = vmul.f32 %v713_v28, %v552_v29 }
 0x31b   : > { %556 = vrot.lane.b32.xlu1 %v554_v30, %s867_s22 }
 0x38d   : > { %v557_v32 = vpop.permute.xlu1 %556 }
 0x38e   : > { %v559_v60 = vadd.f32 %v557_v32, %v549_v31  }
 0x390   : > { %714 = vtanh.f32 %v559_v60 }
 0x39a   : > { %v715_v33 = vpop.eup %714 }
 0x39b   : > { %562 = vrot.lane.b32.xlu1 %v715_v33, %s868_s30 }
 0x40d   : > { %v563_v34 = vpop.permute.xlu1 %562 }
 0x40e   : > { %v565_v61 = vmul.f32 %v713_v28, %v563_v34  }
 0x410   : > { %576 = vrot.lane.b32.xlu1 %v565_v61, %s868_s30  ;;  %569 = vrot.lane.b32.xlu0 %v565_v61, %s867_s22 }
 0x47e   :  { %420 = sbr.rel (!%p418_p12) target bundleno = 327 (0x147), region = 76 }
 0x482   : > { %v577_v35 = vpop.permute.xlu1 %576  ;;  %v570_v36 = vpop.permute.xlu0 %569 }
 0x483   : > { %575 = vst.msk [vmem:[%s573_s27] sm:$0x3] %vm574_vm3, %v570_v36 }
 0x484   : > { %582 = vst.msk [vmem:[%s580_s5 - $0x2] sm:$0xc] %vm581_vm4, %v577_v35 }
 0x485   :  { %587 = vsyncpa [#allocation4], 1 }
 0x486   :  { %588 = vsyncpa [#allocation6], 1 }
 0x487   :  { %589 = vsyncpa [#allocation9], 1 }

// kernel: deep_clustering_forward.7
= control target key start
LH: loop header
LB: loop body
LE: loop exit
PB: predicated region body
PF: predicated region fallthrough
CT: control target
= control target key end

     0   :  { %vm31_vm0 = vcmask 523264   ;;  %s1833_s7 = smov 124   ;;  %s1835_s8 = smov 112   ;;  %v1847_v23 = vmov 1983009808   ;;  %v210_v25 = vlaneseq  ;;  %vm781_vm1 = vcmask 31744   ;;  %s2516_s1 = inlined_call_operand.vmem [shape: f32[64,64], index: 1, kind: input, shape index: {}]   ;;  %s2517_s0 = inlined_call_operand.vmem [shape: f32[16,64], index: 0, kind: input, shape index: {}]   ;;  %s2518_s2 = inlined_call_operand.vmem [shape: f32[1,64], index: 2, kind: input, shape index: {}]   ;;  %s2519_s3 = inlined_call_operand.vmem [shape: f32[16,64], index: 3, kind: output, shape index: {}]  }
   0x1   :  { %v16_v0 = vld [vmem:[%s2516_s1] sm:$0xff]  ;;  %v17_v1 = vld [vmem:[%s2516_s1 + $0x8] sm:$0xff]  ;;  %v18_v2 = vld [vmem:[%s2516_s1 + $0x10] sm:$0xff]  ;;  %s1837_s9 = smov 104   ;;  %s1838_s10 = smov 100   ;;  %v208_v24 = vunpack.c.l.s4 %v1847_v23  ;;  %vm1640_vm2 = vcmask 64512  }
   0x2   :  { %v1720_v3 = vpack.c.bf16 %v17_v1, %v16_v0  ;;  %v19_v4 = vld [vmem:[%s2516_s1 + $0x18] sm:$0xff]  ;;  %v20_v6 = vld [vmem:[%s2516_s1 + $0x20] sm:$0xff]  ;;  %v21_v7 = vld [vmem:[%s2516_s1 + $0x28] sm:$0xff]  ;;  %s1839_s11 = smov 96   ;;  %s1840_s12 = smov 92   ;;  %v211_v29 = vshrl.u32 %v210_v25, 7 }
   0x3   :  { %v1724_v5 = vpack.c.bf16 %v19_v4, %v18_v2  ;;  %v14_v8 = vld [vmem:[%s2517_s0] sm:$0xff]  ;;  %v1728_v9 = vpack.c.bf16 %v21_v7, %v20_v6  ;;  %v22_v10 = vld [vmem:[%s2516_s1 + $0x30] sm:$0xff]  ;;  %v23_v11 = vld [vmem:[%s2516_s1 + $0x38] sm:$0xff]  ;;  %s1832_s1 = smov 120   ;;  %s1841_s13 = smov 88   ;;  %v209_v28 = vunpack.c.0.s8 %v208_v24  ;;  %vm1643_vm3 = vcmask 97280  }
   0x4   :  { %1721 = vmatprep.subr.bf16.mxu0 %v1720_v3  ;;  %1717 = vmatprep.mubr.msk.f32.mxu0 %vm31_vm0, %v14_v8  ;;  %v1732_v12 = vpack.c.bf16 %v23_v11, %v22_v10  ;;  %v15_v13 = vld [vmem:[%s2517_s0 + $0x8] sm:$0xff]  ;;  %v1688_v14 = vld [vmem:[%s2518_s2] ss:$0 sm:$0xff]  ;;  %s1834_s0 = smov 116   ;;  %s1836_s2 = smov 108   ;;  %vm1646_vm4 = vcmask 130048  }
   0x5   :  { %1723 = vmatpush3.bf16.msra.mxu0 %v1720_v3  ;;  %s1842_s14 = smov 84   ;;  %s1843_s15 = smov 80   ;;  %v1848_v33 = vmov 1934713408   ;;  %v1961_v35 = vsub.s32 %v209_v28, %v211_v29  ;;  %vm1649_vm5 = vcmask 162816   ;;  %vm1652_vm6 = vcmask 195584  }
   0x6   :  { %1725 = vmatprep.subr.bf16.mxu0 %v1724_v5  ;;  %s1844_s16 = smov 76   ;;  %s1845_s17 = smov 72   ;;  %v272_v34 = vunpack.c.l.s4 %v1848_v33  ;;  %vm1655_vm7 = vcmask 228352   ;;  %vm1658_vm8 = vcmask 261120   ;;  %vm1661_vm9 = vcmask 293888  }
   0x7   :  { %s1846_s18 = smov 68   ;;  %s1849_s19 = smov 8   ;;  %vm1664_vm10 = vcmask 326656   ;;  %vm1667_vm11 = vcmask 359424   ;;  %vm1670_vm12 = vcmask 392192   ;;  %vm1676_vm13 = vcmask 457728  }
   0x8   :  { %v273_v41 = vunpack.c.0.s8 %v272_v34  ;;  %s1850_s20 = smov 4   ;;  %s1851_s21 = smov 12   ;;  %vm1673_vm14 = vcmask 424960   ;;  %vm1679_vm15 = vcmask 490496  }
   0x9   :  { %1727 = vmatpush3.bf16.msra.mxu0 %v1724_v5  ;;  %s1852_s22 = smov 16   ;;  %s1853_s23 = smov 20  }
   0xa   :  { %1729 = vmatprep.subr.bf16.mxu0 %v1728_v9  ;;  %v1972_v53 = vsub.s32 %v273_v41, %v211_v29  ;;  %s1854_s24 = smov 24   ;;  %s1855_s25 = smov 28  }
   0xb   :  { %s1856_s26 = smov 32   ;;  %s1857_s27 = smov 36  }
   0xc   :  { %s1858_s28 = smov 40   ;;  %s1859_s29 = smov 44  }
   0xd   :  { %1731 = vmatpush3.bf16.msra.mxu0 %v1728_v9  ;;  %s1860_s30 = smov 48   ;;  %s1861_s4 = smov 52  }
   0xe   :  { %1733 = vmatprep.subr.bf16.mxu0 %v1732_v12  ;;  %s1862_s5 = smov 56   ;;  %s1863_s6 = smov 60  }
  0x11   :  { %1735 = vmatpush3.bf16.msra.mxu0 %v1732_v12 }
  0x14   :  { %1718 = vmatmul.mubr.msk.f32.vlgmr.msra.gmra.mrb[0].mxu0 %vm31_vm0, %v15_v13 }
  0xe7   :  { %v1719_v15 = vpop.f32.mrb[0].mxu0 }
  0xe8   :  { %v1919_v16 = vadd.f32 %v1719_v15, %v1688_v14  ;;  %v104_v17 = vpop.f32.mrb[1].mxu0 }
  0xe9   :  { %v1924_v18 = vadd.f32 %v1688_v14, %v104_v17 }
  0xea   :  { %123 = vrot.lane.b32.xlu1 %v1919_v16, %s1832_s1  ;;  %117 = vrot.lane.b32.xlu0 %v1919_v16, %s1833_s7 }
  0xee   :  { %129 = vrot.lane.b32.xlu1 %v1919_v16, %s1834_s0  ;;  %115 = vrot.lane.b32.xlu0 %v1924_v18, %s1833_s7 }
  0xf2   :  { %135 = vrot.lane.b32.xlu1 %v1919_v16, %s1835_s8  ;;  %127 = vrot.lane.b32.xlu0 %v1924_v18, %s1834_s0 }
  0xf6   :  { %141 = vrot.lane.b32.xlu1 %v1919_v16, %s1836_s2  ;;  %133 = vrot.lane.b32.xlu0 %v1924_v18, %s1835_s8 }
  0xfa   :  { %147 = vrot.lane.b32.xlu1 %v1919_v16, %s1837_s9  ;;  %139 = vrot.lane.b32.xlu0 %v1924_v18, %s1836_s2 }
  0xfe   :  { %153 = vrot.lane.b32.xlu1 %v1919_v16, %s1838_s10  ;;  %145 = vrot.lane.b32.xlu0 %v1924_v18, %s1837_s9 }
 0x102   :  { %159 = vrot.lane.b32.xlu1 %v1919_v16, %s1839_s11  ;;  %151 = vrot.lane.b32.xlu0 %v1924_v18, %s1838_s10 }
 0x106   :  { %165 = vrot.lane.b32.xlu1 %v1919_v16, %s1840_s12  ;;  %157 = vrot.lane.b32.xlu0 %v1924_v18, %s1839_s11 }
 0x10a   :  { %171 = vrot.lane.b32.xlu1 %v1919_v16, %s1841_s13  ;;  %163 = vrot.lane.b32.xlu0 %v1924_v18, %s1840_s12 }
 0x10e   :  { %177 = vrot.lane.b32.xlu1 %v1919_v16, %s1842_s14  ;;  %169 = vrot.lane.b32.xlu0 %v1924_v18, %s1841_s13 }
 0x112   :  { %183 = vrot.lane.b32.xlu1 %v1919_v16, %s1843_s15  ;;  %175 = vrot.lane.b32.xlu0 %v1924_v18, %s1842_s14 }
 0x116   :  { %189 = vrot.lane.b32.xlu1 %v1919_v16, %s1844_s16  ;;  %181 = vrot.lane.b32.xlu0 %v1924_v18, %s1843_s15 }
 0x11a   :  { %121 = vrot.lane.b32.xlu1 %v1924_v18, %s1832_s1  ;;  %187 = vrot.lane.b32.xlu0 %v1924_v18, %s1844_s16 }
 0x11e   :  { %195 = vrot.lane.b32.xlu1 %v1919_v16, %s1845_s17  ;;  %193 = vrot.lane.b32.xlu0 %v1924_v18, %s1845_s17 }
 0x122   :  { %201 = vrot.lane.b32.xlu1 %v1919_v16, %s1846_s18  ;;  %199 = vrot.lane.b32.xlu0 %v1924_v18, %s1846_s18 }
 0x15c   :  { %v124_v19 = vpop.permute.xlu1 %123  ;;  %v118_v20 = vpop.permute.xlu0 %117 }
 0x15d   :  { %v477_v36 = vcombine.low %v1919_v16, %v124_v19  ;;  %v478_v44 = vcombine.high %v1919_v16, %v124_v19 }
 0x15f   :  { %v485_v45 = vrot.slane %v477_v36, %v1961_v35  ;;  %v492_v58 = vrot.slane %v478_v44, %v1961_v35 }
 0x160   :  { %v130_v21 = vpop.permute.xlu1 %129  ;;  %v1955_v22 = vpop.permute.xlu0 %115 }
 0x161   :  { %v493_v32 = vcombine.low %v118_v20, %v130_v21  ;;  %v494_v39 = vcombine.high %v118_v20, %v130_v21 }
 0x163   :  { %v501_v40 = vrot.slane %v493_v32, %v1961_v35  ;;  %v508_v50 = vrot.slane %v494_v39, %v1961_v35 }
 0x164   :  { %v136_v26 = vpop.permute.xlu1 %135  ;;  %v1957_v27 = vpop.permute.xlu0 %127 }
 0x165   :  { %v541_v51 = vcombine.low %v485_v45, %v501_v40  ;;  %v542_v52 = vcombine.high %v485_v45, %v501_v40  ;;  %v557_v0 = vcombine.low %v492_v58, %v508_v50  ;;  %v558_v13 = vcombine.high %v492_v58, %v508_v50 }
 0x167   :  { %v549_v1 = vrot.slane %v541_v51, %v1972_v53  ;;  %v556_v3 = vrot.slane %v542_v52, %v1972_v53  ;;  %v565_v16 = vrot.slane %v557_v0, %v1972_v53  ;;  %v572_v29 = vrot.slane %v558_v13, %v1972_v53 }
 0x168   :  { %v142_v30 = vpop.permute.xlu1 %141  ;;  %v1959_v31 = vpop.permute.xlu0 %133 }
 0x16c   :  { %v148_v37 = vpop.permute.xlu1 %147  ;;  %v1964_v38 = vpop.permute.xlu0 %139 }
 0x16d   :  { %v509_v42 = vcombine.low %v136_v26, %v148_v37  ;;  %v510_v43 = vcombine.high %v136_v26, %v148_v37 }
 0x16f   :  { %v517_v54 = vrot.slane %v509_v42, %v1961_v35  ;;  %v524_v55 = vrot.slane %v510_v43, %v1961_v35 }
 0x170   :  { %v154_v46 = vpop.permute.xlu1 %153  ;;  %v1969_v47 = vpop.permute.xlu0 %145 }
 0x171   :  { %v525_v48 = vcombine.low %v142_v30, %v154_v46  ;;  %v526_v49 = vcombine.high %v142_v30, %v154_v46 }
 0x173   :  { %v533_v56 = vrot.slane %v525_v48, %v1961_v35  ;;  %v540_v57 = vrot.slane %v526_v49, %v1961_v35 }
 0x174   :  { %v1979_v59 = vpop.permute.xlu1 %159  ;;  %v1981_v60 = vpop.permute.xlu0 %151 }
 0x175   :  { %v573_v61 = vcombine.low %v517_v54, %v533_v56  ;;  %v574_v62 = vcombine.high %v517_v54, %v533_v56  ;;  %v589_v63 = vcombine.low %v524_v55, %v540_v57  ;;  %v590_v5 = vcombine.high %v524_v55, %v540_v57 }
 0x176   :  { %v221_v57 = vcombine.low %v1955_v22, %v1957_v27 }
 0x177   :  { %v581_v2 = vrot.slane %v573_v61, %v1972_v53  ;;  %v588_v4 = vrot.slane %v574_v62, %v1972_v53  ;;  %v597_v8 = vrot.slane %v589_v63, %v1972_v53  ;;  %v604_v23 = vrot.slane %v590_v5, %v1972_v53 }
 0x178   :  { %v1987_v6 = vpop.permute.xlu1 %165  ;;  %v1989_v7 = vpop.permute.xlu0 %157 }
 0x179   :  { %v1992_v9 = vcombine.low %v549_v1, %v581_v2  ;;  %v1994_v10 = vcombine.high %v549_v1, %v581_v2  ;;  %v1996_v11 = vcombine.low %v556_v3, %v588_v4  ;;  %v1998_v12 = vcombine.high %v556_v3, %v588_v4 }
 0x17a   :  { %v2016_v26 = vcombine.low %v565_v16, %v597_v8  ;;  %v2018_v28 = vcombine.high %v565_v16, %v597_v8  ;;  %v2023_v33 = vcombine.low %v572_v29, %v604_v23  ;;  %v2031_v40 = vcombine.high %v572_v29, %v604_v23 }
 0x17b   :  { %v765_v14 = vmul.f32 %v1992_v9, %v1992_v9  ;;  %v767_v15 = vmul.f32 %v1994_v10, %v1994_v10  ;;  %v769_v20 = vmul.f32 %v1996_v11, %v1996_v11  ;;  %v771_v21 = vmul.f32 %v1998_v12, %v1998_v12 }
 0x17c   :  { %v2005_v17 = vpop.permute.xlu1 %171  ;;  %v2007_v19 = vpop.permute.xlu0 %163  ;;  %v773_v37 = vmul.f32 %v2016_v26, %v2016_v26  ;;  %v775_v39 = vmul.f32 %v2018_v28, %v2018_v28  ;;  %v777_v45 = vmul.f32 %v2023_v33, %v2023_v33  ;;  %v779_v46 = vmul.f32 %v2031_v40, %v2031_v40 }
 0x17d   :  { %v830_v24 = vsel %vm781_vm1, %v765_v14, 0.0  ;;  %v836_v25 = vsel %vm781_vm1, %v767_v15, 0.0  ;;  %v842_v34 = vsel %vm781_vm1, %v769_v20, 0.0  ;;  %v848_v36 = vsel %vm781_vm1, %v771_v21, 0.0 }
 0x17e   :  { %831 = vadd.xlane.f32.xlu1 %v830_v24  ;;  %837 = vadd.xlane.f32.xlu0 %v836_v25  ;;  %v854_v43 = vsel %vm781_vm1, %v773_v37, 0.0  ;;  %v860_v44 = vsel %vm781_vm1, %v775_v39, 0.0  ;;  %v866_v49 = vsel %vm781_vm1, %v777_v45, 0.0  ;;  %v872_v50 = vsel %vm781_vm1, %v779_v46, 0.0 }
 0x17f   :  { %v613_v55 = vcombine.low %v1979_v59, %v2005_v17  ;;  %v222_v1 = vcombine.high %v1955_v22, %v1957_v27  ;;  %v614_v2 = vcombine.high %v1979_v59, %v2005_v17  ;;  %v2061_v8 = vrot.slane %v221_v57, %v1961_v35 }
 0x180   :  { %v178_v30 = vpop.permute.xlu1 %177  ;;  %v2021_v32 = vpop.permute.xlu0 %169  ;;  %v237_v24 = vcombine.low %v1959_v31, %v1969_v47  ;;  %v238_v25 = vcombine.high %v1959_v31, %v1969_v47  ;;  %v254_v39 = vcombine.high %v1964_v38, %v1981_v60 }
 0x181   :  { %v629_v54 = vcombine.low %v1987_v6, %v178_v30  ;;  %v630_v61 = vcombine.high %v1987_v6, %v178_v30  ;;  %v621_v3 = vrot.slane %v613_v55, %v1961_v35  ;;  %v253_v6 = vcombine.low %v1964_v38, %v1981_v60 }
 0x182   :  { %843 = vadd.xlane.f32.xlu1 %v842_v34  ;;  %849 = vadd.xlane.f32.xlu0 %v848_v36  ;;  %v2088_v30 = vrot.slane %v222_v1, %v1961_v35  ;;  %v268_v57 = vrot.slane %v254_v39, %v1961_v35 }
 0x183   :  { %v637_v62 = vrot.slane %v629_v54, %v1961_v35  ;;  %v2066_v15 = vrot.slane %v630_v61, %v1961_v35 }
 0x184   :  { %v184_v41 = vpop.permute.xlu1 %183  ;;  %v2033_v42 = vpop.permute.xlu0 %175 }
 0x185   :  { %v677_v22 = vcombine.low %v621_v3, %v637_v62  ;;  %v678_v27 = vcombine.high %v621_v3, %v637_v62 }
 0x186   :  { %855 = vadd.xlane.f32.xlu1 %v854_v43  ;;  %861 = vadd.xlane.f32.xlu0 %v860_v44 }
 0x187   :  { %v685_v47 = vrot.slane %v677_v22, %v1972_v53  ;;  %v692_v45 = vrot.slane %v678_v27, %v1972_v53 }
 0x188   :  { %v190_v48 = vpop.permute.xlu1 %189  ;;  %v2043_v51 = vpop.permute.xlu0 %181 }
 0x18a   :  { %867 = vadd.xlane.f32.xlu1 %v866_v49  ;;  %873 = vadd.xlane.f32.xlu0 %v872_v50  ;;  %v252_v49 = vrot.slane %v238_v25, %v1961_v35 }
 0x18c   :  { %v122_v52 = vpop.permute.xlu1 %121  ;;  %v2050_v58 = vpop.permute.xlu0 %187 }
 0x18d   :  { %v205_v4 = vcombine.low %v1924_v18, %v122_v52  ;;  %v206_v59 = vcombine.high %v1924_v18, %v122_v52  ;;  %v2084_v18 = vrot.slane %v614_v2, %v1961_v35 }
 0x18f   :  { %v213_v29 = vrot.slane %v205_v4, %v1961_v35  ;;  %v693_v31 = vcombine.low %v2084_v18, %v2066_v15  ;;  %v220_v43 = vrot.slane %v206_v59, %v1961_v35  ;;  %v317_v59 = vcombine.low %v252_v49, %v268_v57 }
 0x190   :  { %v196_v56 = vpop.permute.xlu1 %195  ;;  %v2073_v20 = vpop.permute.xlu0 %193 }
 0x191   :  { %v645_v63 = vcombine.low %v184_v41, %v196_v56  ;;  %v646_v0 = vcombine.high %v184_v41, %v196_v56  ;;  %v261_v41 = vrot.slane %v253_v6, %v1961_v35  ;;  %v269_v38 = vcombine.low %v213_v29, %v2061_v8 }
 0x192   :  { %v285_v1 = vcombine.low %v220_v43, %v2088_v30  ;;  %v286_v25 = vcombine.high %v220_v43, %v2088_v30 }
 0x193   :  { %v653_v16 = vrot.slane %v645_v63, %v1961_v35  ;;  %v2071_v17 = vrot.slane %v646_v0, %v1961_v35  ;;  %v701_v63 = vrot.slane %v693_v31, %v1972_v53  ;;  %v270_v0 = vcombine.high %v213_v29, %v2061_v8 }
 0x194   :  { %v202_v5 = vpop.permute.xlu1 %201  ;;  %v2106_v50 = vpop.permute.xlu0 %199  ;;  %v373_v29 = vcombine.low %v2043_v51, %v2073_v20 }
 0x195   :  { %v661_v13 = vcombine.low %v190_v48, %v202_v5  ;;  %v662_v14 = vcombine.high %v190_v48, %v202_v5  ;;  %v245_v48 = vrot.slane %v237_v24, %v1961_v35  ;;  %v389_v4 = vcombine.low %v2050_v58, %v2106_v50 }
 0x196   :  { %v357_v24 = vcombine.low %v2007_v19, %v2033_v42 }
 0x197   :  { %v669_v21 = vrot.slane %v661_v13, %v1961_v35  ;;  %v2077_v23 = vrot.slane %v662_v14, %v1961_v35  ;;  %v301_v61 = vcombine.low %v245_v48, %v261_v41  ;;  %v302_v62 = vcombine.high %v245_v48, %v261_v41 }
 0x198   :  { %v277_v13 = vrot.slane %v269_v38, %v1972_v53  ;;  %v284_v41 = vrot.slane %v270_v0, %v1972_v53  ;;  %v365_v38 = vrot.slane %v357_v24, %v1961_v35 }
 0x199   :  { %v709_v34 = vcombine.low %v653_v16, %v669_v21  ;;  %v710_v36 = vcombine.high %v653_v16, %v669_v21  ;;  %v725_v37 = vcombine.low %v2071_v17, %v2077_v23  ;;  %v341_v16 = vcombine.low %v1989_v7, %v2021_v32 }
 0x19a   :  { %v309_v21 = vrot.slane %v301_v61, %v1972_v53  ;;  %v390_v61 = vcombine.high %v2050_v58, %v2106_v50  ;;  %v374_v58 = vcombine.high %v2043_v51, %v2073_v20 }
 0x19b   :  { %v717_v44 = vrot.slane %v709_v34, %v1972_v53  ;;  %v724_v46 = vrot.slane %v710_v36, %v1972_v53  ;;  %v733_v60 = vrot.slane %v725_v37, %v1972_v53  ;;  %v293_v34 = vrot.slane %v285_v1, %v1972_v53 }
 0x19c   :  { %v397_v36 = vrot.slane %v389_v4, %v1961_v35  ;;  %v2147_v37 = vcombine.high %v277_v13, %v309_v21  ;;  %v2149_v39 = vcombine.low %v277_v13, %v309_v21  ;;  %v349_v48 = vrot.slane %v341_v16, %v1961_v35 }
 0x19d   :  { %v2108_v52 = vcombine.low %v685_v47, %v717_v44  ;;  %v2110_v54 = vcombine.high %v685_v47, %v717_v44  ;;  %v2112_v55 = vcombine.low %v692_v45, %v724_v46  ;;  %v2114_v56 = vcombine.high %v692_v45, %v724_v46 }
 0x19e   :  { %v2126_v5 = vcombine.low %v701_v63, %v733_v60  ;;  %v2128_v6 = vcombine.high %v701_v63, %v733_v60  ;;  %v318_v44 = vcombine.high %v252_v49, %v268_v57  ;;  %v325_v45 = vrot.slane %v317_v59, %v1972_v53 }
 0x19f   :  { %v766_v2 = vmul.f32 %v2108_v52, %v2108_v52  ;;  %v768_v3 = vmul.f32 %v2110_v54, %v2110_v54  ;;  %v770_v22 = vmul.f32 %v2112_v55, %v2112_v55  ;;  %v772_v27 = vmul.f32 %v2114_v56, %v2114_v56 }
 0x1a0   :  { %v774_v30 = vmul.f32 %v2126_v5, %v2126_v5  ;;  %v776_v43 = vmul.f32 %v2128_v6, %v2128_v6  ;;  %v316_v46 = vrot.slane %v302_v62, %v1972_v53  ;;  %v381_v60 = vrot.slane %v373_v29, %v1961_v35 }
 0x1a1   :  { %v833_v14 = vsel %vm781_vm1, %v766_v2, 0.0  ;;  %v839_v8 = vsel %vm781_vm1, %v768_v3, 0.0  ;;  %v845_v31 = vsel %vm781_vm1, %v770_v22, 0.0  ;;  %v851_v47 = vsel %vm781_vm1, %v772_v27, 0.0 }
 0x1a2   :  { %834 = vadd.xlane.f32.xlu1 %v833_v14  ;;  %840 = vadd.xlane.f32.xlu0 %v839_v8  ;;  %v751_v63 = vmul.f32 %v2147_v37, %v2147_v37  ;;  %v2167_v0 = vcombine.low %v293_v34, %v325_v45  ;;  %v2169_v49 = vcombine.low %v284_v41, %v316_v46  ;;  %v857_v62 = vsel %vm781_vm1, %v774_v30, 0.0 }
 0x1a3   :  { %v300_v57 = vrot.slane %v286_v25, %v1972_v53  ;;  %v437_v1 = vcombine.low %v381_v60, %v397_v36  ;;  %v863_v2 = vsel %vm781_vm1, %v776_v43, 0.0  ;;  %v749_v3 = vmul.f32 %v2149_v39, %v2149_v39 }
 0x1a4   :  { %v332_v50 = vrot.slane %v318_v44, %v1972_v53  ;;  %v342_v4 = vcombine.high %v1989_v7, %v2021_v32  ;;  %v358_v13 = vcombine.high %v2007_v19, %v2033_v42  ;;  %v405_v14 = vcombine.low %v349_v48, %v365_v38 }
 0x1a5   :  { %v404_v8 = vrot.slane %v390_v61, %v1961_v35  ;;  %v757_v22 = vmul.f32 %v2167_v0, %v2167_v0  ;;  %v753_v27 = vmul.f32 %v2169_v49, %v2169_v49  ;;  %v2190_v20 = vcombine.high %v284_v41, %v316_v46 }
 0x1a6   :  { %846 = vadd.xlane.f32.xlu1 %v845_v31  ;;  %852 = vadd.xlane.f32.xlu0 %v851_v47  ;;  %v2188_v51 = vcombine.low %v300_v57, %v332_v50  ;;  %v438_v59 = vcombine.high %v381_v60, %v397_v36  ;;  %v788_v16 = vsel %vm781_vm1, %v751_v63, 0.0  ;;  %v782_v7 = vsel %vm781_vm1, %v749_v3, 0.0 }
 0x1a7   :  { %v445_v19 = vrot.slane %v437_v1, %v1972_v53  ;;  %v388_v32 = vrot.slane %v374_v58, %v1961_v35  ;;  %v356_v42 = vrot.slane %v342_v4, %v1961_v35  ;;  %v372_v21 = vrot.slane %v358_v13, %v1961_v35 }
 0x1a8   :  { %v406_v24 = vcombine.high %v349_v48, %v365_v38  ;;  %v413_v25 = vrot.slane %v405_v14, %v1972_v53  ;;  %v806_v36 = vsel %vm781_vm1, %v757_v22, 0.0  ;;  %v761_v41 = vmul.f32 %v2188_v51, %v2188_v51 }
 0x1a9   :  { %v453_v29 = vcombine.low %v388_v32, %v404_v8  ;;  %v755_v31 = vmul.f32 %v2190_v20, %v2190_v20  ;;  %v794_v47 = vsel %vm781_vm1, %v753_v27, 0.0  ;;  %v2205_v30 = vcombine.high %v293_v34, %v325_v45 }
 0x1aa   :  { %858 = vadd.xlane.f32.xlu1 %v857_v62  ;;  %864 = vadd.xlane.f32.xlu0 %v863_v2  ;;  %v2207_v43 = vcombine.low %v413_v25, %v445_v19  ;;  %v452_v44 = vrot.slane %v438_v59, %v1972_v53  ;;  %v421_v46 = vcombine.low %v356_v42, %v372_v21  ;;  %v818_v60 = vsel %vm781_vm1, %v761_v41, 0.0 }
 0x1ab   :  { %v420_v48 = vrot.slane %v406_v24, %v1972_v53  ;;  %v454_v38 = vcombine.high %v388_v32, %v404_v8  ;;  %v800_v61 = vsel %vm781_vm1, %v755_v31, 0.0  ;;  %v2213_v63 = vcombine.high %v300_v57, %v332_v50 }
 0x1ac   :  { %v759_v34 = vmul.f32 %v2205_v30, %v2205_v30  ;;  %v750_v45 = vmul.f32 %v2207_v43, %v2207_v43  ;;  %v461_v62 = vrot.slane %v453_v29, %v1972_v53  ;;  %v422_v2 = vcombine.high %v356_v42, %v372_v21 }
 0x1ad   :  { %v2219_v1 = vcombine.low %v420_v48, %v452_v44  ;;  %v429_v3 = vrot.slane %v421_v46, %v1972_v53  ;;  %v726_v58 = vcombine.high %v2071_v17, %v2077_v23  ;;  %v763_v57 = vmul.f32 %v2213_v63, %v2213_v63 }
 0x1ae   :  { %789 = vadd.xlane.f32.xlu1 %v788_v16  ;;  %783 = vadd.xlane.f32.xlu0 %v782_v7  ;;  %v2227_v50 = vcombine.high %v413_v25, %v445_v19  ;;  %v468_v4 = vrot.slane %v454_v38, %v1972_v53  ;;  %v812_v13 = vsel %vm781_vm1, %v759_v34, 0.0  ;;  %v785_v14 = vsel %vm781_vm1, %v750_v45, 0.0 }
 0x1af   :  { %v754_v8 = vmul.f32 %v2219_v1, %v2219_v1  ;;  %v2234_v22 = vcombine.low %v429_v3, %v461_v62  ;;  %v436_v17 = vrot.slane %v422_v2, %v1972_v53  ;;  %v694_v23 = vcombine.high %v2084_v18, %v2066_v15 }
 0x1b0   :  { %v2239_v27 = vcombine.high %v420_v48, %v452_v44  ;;  %v740_v16 = vrot.slane %v726_v58, %v1972_v53  ;;  %v824_v7 = vsel %vm781_vm1, %v763_v57, 0.0  ;;  %v752_v32 = vmul.f32 %v2227_v50, %v2227_v50 }
 0x1b1   :  { %v2241_v59 = vcombine.low %v436_v17, %v468_v4  ;;  %v797_v19 = vsel %vm781_vm1, %v754_v8, 0.0  ;;  %v758_v42 = vmul.f32 %v2234_v22, %v2234_v22  ;;  %v708_v15 = vrot.slane %v694_v23, %v1972_v53 }
 0x1b2   :  { %807 = vadd.xlane.f32.xlu1 %v806_v36  ;;  %795 = vadd.xlane.f32.xlu0 %v794_v47  ;;  %v756_v18 = vmul.f32 %v2239_v27, %v2239_v27  ;;  %v791_v24 = vsel %vm781_vm1, %v752_v32, 0.0  ;;  %v2257_v29 = vcombine.high %v429_v3, %v461_v62  ;;  %v2267_v46 = vcombine.high %v436_v17, %v468_v4 }
 0x1b3   :  { %v762_v21 = vmul.f32 %v2241_v59, %v2241_v59  ;;  %v809_v25 = vsel %vm781_vm1, %v758_v42, 0.0  ;;  %v2259_v36 = vcombine.low %v708_v15, %v740_v16 }
 0x1b4   :  { %v803_v41 = vsel %vm781_vm1, %v756_v18, 0.0  ;;  %v760_v47 = vmul.f32 %v2257_v29, %v2257_v29 }
 0x1b5   :  { %v821_v31 = vsel %vm781_vm1, %v762_v21, 0.0  ;;  %v778_v44 = vmul.f32 %v2259_v36, %v2259_v36 }
 0x1b6   :  { %819 = vadd.xlane.f32.xlu1 %v818_v60  ;;  %801 = vadd.xlane.f32.xlu0 %v800_v61  ;;  %v815_v48 = vsel %vm781_vm1, %v760_v47, 0.0  ;;  %v764_v60 = vmul.f32 %v2267_v46, %v2267_v46  ;;  %v2273_v61 = vcombine.high %v708_v15, %v740_v16 }
 0x1b7   :  { %v869_v38 = vsel %vm781_vm1, %v778_v44, 0.0 }
 0x1b8   :  { %v827_v34 = vsel %vm781_vm1, %v764_v60, 0.0  ;;  %v780_v45 = vmul.f32 %v2273_v61, %v2273_v61 }
 0x1ba   :  { %813 = vadd.xlane.f32.xlu0 %v812_v13  ;;  %786 = vadd.xlane.f32.xlu1 %v785_v14  ;;  %v875_v62 = vsel %vm781_vm1, %v780_v45, 0.0 }
 0x1be   :  { %825 = vadd.xlane.f32.xlu0 %v824_v7  ;;  %798 = vadd.xlane.f32.xlu1 %v797_v19 }
 0x1c2   :  { %792 = vadd.xlane.f32.xlu0 %v791_v24  ;;  %810 = vadd.xlane.f32.xlu1 %v809_v25 }
 0x1c6   :  { %804 = vadd.xlane.f32.xlu0 %v803_v41  ;;  %822 = vadd.xlane.f32.xlu1 %v821_v31 }
 0x1ca   :  { %816 = vadd.xlane.f32.xlu0 %v815_v48  ;;  %870 = vadd.xlane.f32.xlu1 %v869_v38 }
 0x1ce   :  { %828 = vadd.xlane.f32.xlu0 %v827_v34 }
 0x1d2   :  { %876 = vadd.xlane.f32.xlu0 %v875_v62 }
 0x20b   :  { %v832_v2 = vpop.xlane.xlu1 %831  ;;  %v838_v3 = vpop.xlane.xlu0 %837 }
 0x20c   :  { %v894_v58 = vmax.f32 %v832_v2, 1e-24  ;;  %v896_v57 = vmax.f32 %v838_v3, 1e-24 }
 0x20e   :  { %1768 = vrsqrt.f32 %v894_v58 }
 0x20f   :  { %v844_v4 = vpop.xlane.xlu1 %843  ;;  %v850_v13 = vpop.xlane.xlu0 %849  ;;  %1770 = vrsqrt.f32 %v896_v57 }
 0x210   :  { %v898_v14 = vmax.f32 %v844_v4, 1e-24  ;;  %v900_v8 = vmax.f32 %v850_v13, 1e-24 }
 0x212   :  { %1772 = vrsqrt.f32 %v898_v14 }
 0x213   :  { %1774 = vrsqrt.f32 %v900_v8  ;;  %v856_v17 = vpop.xlane.xlu1 %855  ;;  %v862_v23 = vpop.xlane.xlu0 %861 }
 0x214   :  { %v902_v16 = vmax.f32 %v856_v17, 1e-24  ;;  %v904_v7 = vmax.f32 %v862_v23, 1e-24 }
 0x216   :  { %1776 = vrsqrt.f32 %v902_v16 }
 0x217   :  { %v868_v19 = vpop.xlane.xlu1 %867  ;;  %v874_v42 = vpop.xlane.xlu0 %873  ;;  %1778 = vrsqrt.f32 %v904_v7 }
 0x218   :  { %v906_v32 = vmax.f32 %v868_v19, 1e-24  ;;  %v908_v15 = vmax.f32 %v874_v42, 1e-24  ;;  %v1769_v18 = vpop.eup %1768 }
 0x219   :  { %v1771_v21 = vpop.eup %1770  ;;  %v958_v47 = vmul.f32 %v1769_v18, %v1992_v9 }
 0x21a   :  { %1780 = vrsqrt.f32 %v906_v32  ;;  %v960_v44 = vmul.f32 %v1771_v21, %v1994_v10 }
 0x21b   :  { %1782 = vrsqrt.f32 %v908_v15 }
 0x21c   :  { %v1773_v24 = vpop.eup %1772 }
 0x21d   :  { %v1775_v25 = vpop.eup %1774  ;;  %v962_v41 = vmul.f32 %v1773_v24, %v1996_v11 }
 0x21e   :  { %v964_v31 = vmul.f32 %v1775_v25, %v1998_v12 }
 0x21f   :  { %v1110_v38 = vcombine.low %v958_v47, %v962_v41  ;;  %v1111_v8 = vcombine.high %v958_v47, %v962_v41 }
 0x220   :  { %v1777_v48 = vpop.eup %1776  ;;  %v1126_v60 = vcombine.low %v960_v44, %v964_v31  ;;  %v1127_v17 = vcombine.high %v960_v44, %v964_v31 }
 0x221   :  { %v1779_v34 = vpop.eup %1778  ;;  %v966_v2 = vmul.f32 %v1777_v48, %v2016_v26  ;;  %v1118_v12 = vrot.slane %v1110_v38, %v1961_v35  ;;  %v1125_v19 = vrot.slane %v1111_v8, %v1961_v35 }
 0x222   :  { %v968_v58 = vmul.f32 %v1779_v34, %v2018_v28  ;;  %v1134_v9 = vrot.slane %v1126_v60, %v1961_v35  ;;  %v1141_v32 = vrot.slane %v1127_v17, %v1961_v35 }
 0x224   :  { %v1781_v45 = vpop.eup %1780  ;;  %v1175_v23 = vcombine.high %v1118_v12, %v1134_v9  ;;  %v1190_v44 = vcombine.low %v1125_v19, %v1141_v32 }
 0x225   :  { %v1783_v62 = vpop.eup %1782  ;;  %v970_v3 = vmul.f32 %v1781_v45, %v2023_v33  ;;  %v1174_v33 = vcombine.low %v1118_v12, %v1134_v9  ;;  %v1191_v12 = vcombine.high %v1125_v19, %v1141_v32 }
 0x226   :  { %v972_v11 = vmul.f32 %v1783_v62, %v2031_v40  ;;  %v1189_v42 = vrot.slane %v1175_v23, %v1972_v53  ;;  %v1198_v62 = vrot.slane %v1190_v44, %v1972_v53 }
 0x227   :  { %v1142_v57 = vcombine.low %v966_v2, %v970_v3  ;;  %v1143_v4 = vcombine.high %v966_v2, %v970_v3  ;;  %v2298_v18 = vrot.slane %v1174_v33, %v1972_v53 }
 0x228   :  { %v1158_v10 = vcombine.low %v968_v58, %v972_v11  ;;  %v1159_v13 = vcombine.high %v968_v58, %v972_v11 }
 0x229   :  { %v1150_v14 = vrot.slane %v1142_v57, %v1961_v35  ;;  %v1157_v40 = vrot.slane %v1143_v4, %v1961_v35 }
 0x22a   :  { %v1166_v26 = vrot.slane %v1158_v10, %v1961_v35  ;;  %v1173_v7 = vrot.slane %v1159_v13, %v1961_v35  ;;  %v1205_v13 = vrot.slane %v1191_v12, %v1972_v53 }
 0x22c   :  { %v1207_v16 = vcombine.high %v1150_v14, %v1166_v26  ;;  %v1206_v28 = vcombine.low %v1150_v14, %v1166_v26  ;;  %v1222_v47 = vcombine.low %v1157_v40, %v1173_v7  ;;  %v1223_v11 = vcombine.high %v1157_v40, %v1173_v7 }
 0x22e   :  { %v1221_v15 = vrot.slane %v1207_v16, %v1972_v53  ;;  %v2301_v21 = vrot.slane %v1206_v28, %v1972_v53  ;;  %v1230_v45 = vrot.slane %v1222_v47, %v1972_v53  ;;  %v1237_v4 = vrot.slane %v1223_v11, %v1972_v53 }
 0x22f   :  { %v2303_v24 = vpop.xlane.xlu1 %834  ;;  %v2305_v25 = vpop.xlane.xlu0 %840 }
 0x230   :  { %v1240_v41 = vcombine.low %v1189_v42, %v1221_v15  ;;  %v1239_v31 = vcombine.high %v2298_v18, %v2301_v21  ;;  %v1238_v48 = vcombine.low %v2298_v18, %v2301_v21  ;;  %v1241_v34 = vcombine.high %v1189_v42, %v1221_v15 }
 0x231   :  { %v1242_v58 = vcombine.low %v1198_v62, %v1230_v45  ;;  %v1243_v10 = vcombine.high %v1198_v62, %v1230_v45  ;;  %v1244_v26 = vcombine.low %v1205_v13, %v1237_v4  ;;  %v1245_v19 = vcombine.high %v1205_v13, %v1237_v4 }
 0x232   :  { %1530 = vrot.lane.b32.xlu1 %v1240_v41, %s1849_s19  ;;  %1522 = vrot.lane.b32.xlu0 %v1239_v31, %s1850_s20  ;;  %v897_v62 = vmax.f32 %v2305_v25, 1e-24 }
 0x233   :  { %v2313_v38 = vpop.xlane.xlu1 %846  ;;  %v2315_v60 = vpop.xlane.xlu0 %852 }
 0x234   :  { %v899_v11 = vmax.f32 %v2313_v38, 1e-24 }
 0x236   :  { %1538 = vrot.lane.b32.xlu1 %v1241_v34, %s1851_s21  ;;  %v895_v34 = vmax.f32 %v2303_v24, 1e-24 }
 0x237   :  { %v2320_v2 = vpop.xlane.xlu1 %858  ;;  %v2322_v3 = vpop.xlane.xlu0 %864 }
 0x238   :  { %v903_v13 = vmax.f32 %v2320_v2, 1e-24 }
 0x23a   :  { %1546 = vrot.lane.b32.xlu1 %v1242_v58, %s1852_s22 }
 0x23b   :  { %v790_v9 = vpop.xlane.xlu1 %789  ;;  %v784_v57 = vpop.xlane.xlu0 %783 }
 0x23c   :  { %v880_v17 = vmax.f32 %v790_v9, 1e-24  ;;  %v878_v23 = vmax.f32 %v784_v57, 1e-24 }
 0x23e   :  { %1554 = vrot.lane.b32.xlu1 %v1243_v10, %s1853_s23  ;;  %1784 = vrsqrt.f32 %v880_v17  ;;  %v901_v10 = vmax.f32 %v2315_v60, 1e-24 }
 0x23f   :  { %v808_v14 = vpop.xlane.xlu1 %807  ;;  %v796_v8 = vpop.xlane.xlu0 %795  ;;  %1786 = vrsqrt.f32 %v878_v23 }
 0x240   :  { %v882_v33 = vmax.f32 %v796_v8, 1e-24  ;;  %v886_v32 = vmax.f32 %v808_v14, 1e-24 }
 0x242   :  { %1562 = vrot.lane.b32.xlu1 %v1244_v26, %s1854_s24  ;;  %1788 = vrsqrt.f32 %v882_v33 }
 0x243   :  { %v820_v16 = vpop.xlane.xlu1 %819  ;;  %v802_v28 = vpop.xlane.xlu0 %801 }
 0x244   :  { %v890_v40 = vmax.f32 %v820_v16, 1e-24  ;;  %v884_v7 = vmax.f32 %v802_v28, 1e-24 }
 0x246   :  { %1570 = vrot.lane.b32.xlu1 %v1245_v19, %s1855_s25  ;;  %1790 = vrsqrt.f32 %v884_v7 }
 0x247   :  { %v2330_v42 = vpop.xlane.xlu1 %786  ;;  %v814_v15 = vpop.xlane.xlu0 %813  ;;  %1792 = vrsqrt.f32 %v890_v40 }
 0x248   :  { %v888_v41 = vmax.f32 %v814_v15, 1e-24  ;;  %1794 = vrsqrt.f32 %v886_v32  ;;  %v1785_v45 = vpop.eup %1784 }
 0x249   :  { %v1787_v58 = vpop.eup %1786  ;;  %v944_v33 = vmul.f32 %v1785_v45, %v2147_v37 }
 0x24a   :  { %1796 = vrsqrt.f32 %v888_v41  ;;  %v942_v16 = vmul.f32 %v1787_v58, %v2149_v39  ;;  %v879_v41 = vmax.f32 %v2330_v42, 1e-24  ;;  %v905_v58 = vmax.f32 %v2322_v3, 1e-24 }
 0x24b   :  { %v799_v31 = vpop.xlane.xlu1 %798  ;;  %v826_v47 = vpop.xlane.xlu0 %825 }
 0x24c   :  { %v892_v44 = vmax.f32 %v826_v47, 1e-24  ;;  %v1789_v57 = vpop.eup %1788  ;;  %v883_v8 = vmax.f32 %v799_v31, 1e-24 }
 0x24d   :  { %v946_v25 = vmul.f32 %v1789_v57, %v2169_v49 }
 0x24e   :  { %1798 = vrsqrt.f32 %v892_v44 }
 0x24f   :  { %v811_v12 = vpop.xlane.xlu1 %810  ;;  %v793_v9 = vpop.xlane.xlu0 %792  ;;  %1800 = vrsqrt.f32 %v895_v34  ;;  %v974_v15 = vcombine.low %v942_v16, %v946_v25 }
 0x250   :  { %v1791_v4 = vpop.eup %1790  ;;  %1802 = vrsqrt.f32 %v897_v62  ;;  %v887_v17 = vmax.f32 %v811_v12, 1e-24  ;;  %v975_v12 = vcombine.high %v942_v16, %v946_v25 }
 0x251   :  { %v1793_v14 = vpop.eup %1792  ;;  %v948_v24 = vmul.f32 %v1791_v4, %v2190_v20  ;;  %1804 = vrsqrt.f32 %v899_v11  ;;  %v881_v20 = vmax.f32 %v793_v9, 1e-24  ;;  %v982_v11 = vrot.slane %v974_v15, %v1961_v35 }
 0x252   :  { %v1795_v23 = vpop.eup %1794  ;;  %1806 = vrsqrt.f32 %v901_v10  ;;  %v954_v2 = vmul.f32 %v1793_v14, %v2188_v51 }
 0x253   :  { %v823_v38 = vpop.xlane.xlu1 %822  ;;  %v805_v26 = vpop.xlane.xlu0 %804  ;;  %1808 = vrsqrt.f32 %v903_v13  ;;  %v990_v40 = vcombine.low %v944_v33, %v948_v24  ;;  %v950_v49 = vmul.f32 %v1795_v23, %v2167_v0  ;;  %v991_v51 = vcombine.high %v944_v33, %v948_v24 }
 0x254   :  { %v891_v60 = vmax.f32 %v823_v38, 1e-24  ;;  %v885_v28 = vmax.f32 %v805_v26, 1e-24  ;;  %1810 = vrsqrt.f32 %v883_v8  ;;  %v1797_v7 = vpop.eup %1796 }
 0x255   :  { %1812 = vrsqrt.f32 %v887_v17  ;;  %v1006_v39 = vcombine.low %v950_v49, %v954_v2  ;;  %v1007_v44 = vcombine.high %v950_v49, %v954_v2  ;;  %v952_v34 = vmul.f32 %v1797_v7, %v2205_v30 }
 0x256   :  { %1814 = vrsqrt.f32 %v891_v60  ;;  %v998_v0 = vrot.slane %v990_v40, %v1961_v35  ;;  %v989_v60 = vrot.slane %v975_v12, %v1961_v35 }
 0x257   :  { %v871_v19 = vpop.xlane.xlu1 %870  ;;  %v817_v32 = vpop.xlane.xlu0 %816  ;;  %1816 = vrsqrt.f32 %v885_v28  ;;  %v1014_v30 = vrot.slane %v1006_v39, %v1961_v35  ;;  %v2354_v14 = vrot.slane %v1007_v44, %v1961_v35 }
 0x258   :  { %v907_v37 = vmax.f32 %v871_v19, 1e-24  ;;  %v889_v31 = vmax.f32 %v817_v32, 1e-24  ;;  %v1799_v47 = vpop.eup %1798  ;;  %1818 = vrsqrt.f32 %v881_v20  ;;  %v1039_v8 = vcombine.high %v982_v11, %v998_v0 }
 0x259   :  { %v956_v45 = vmul.f32 %v1799_v47, %v2213_v63  ;;  %v1801_v62 = vpop.eup %1800  ;;  %v2351_v63 = vrot.slane %v991_v51, %v1961_v35 }
 0x25a   :  { %1820 = vrsqrt.f32 %v907_v37  ;;  %v1803_v9 = vpop.eup %1802  ;;  %v2361_v40 = vrot.slane %v1039_v8, %v1972_v53  ;;  %v2377_v51 = vmul.f32 %v1801_v62, %v2108_v52 }
 0x25b   :  { %v829_v42 = vpop.xlane.xlu0 %828  ;;  %1822 = vrsqrt.f32 %v889_v31  ;;  %v1022_v10 = vcombine.low %v952_v34, %v956_v45  ;;  %v1023_v4 = vcombine.high %v952_v34, %v956_v45  ;;  %v1805_v13 = vpop.eup %1804  ;;  %v1054_v49 = vcombine.low %v989_v60, %v2351_v63 }
 0x25c   :  { %v893_v57 = vmax.f32 %v829_v42, 1e-24  ;;  %1824 = vrsqrt.f32 %v879_v41  ;;  %v1807_v3 = vpop.eup %1806  ;;  %v2368_v32 = vmul.f32 %v1805_v13, %v2112_v55  ;;  %v1038_v41 = vcombine.low %v982_v11, %v998_v0 }
 0x25d   :  { %v1030_v24 = vrot.slane %v1022_v10, %v1961_v35  ;;  %v1037_v25 = vrot.slane %v1023_v4, %v1961_v35  ;;  %v1809_v17 = vpop.eup %1808  ;;  %v2371_v15 = vmul.f32 %v1807_v3, %v2114_v56  ;;  %v2380_v44 = vmul.f32 %v1803_v9, %v2110_v54 }
 0x25e   :  { %1826 = vrsqrt.f32 %v893_v57  ;;  %v1811_v26 = vpop.eup %1810  ;;  %v1062_v0 = vrot.slane %v1054_v49, %v1972_v53  ;;  %v1382_v54 = vcombine.low %v2377_v51, %v2368_v32 }
 0x25f   :  { %1828 = vrsqrt.f32 %v905_v58  ;;  %v877_v38 = vpop.xlane.xlu0 %876  ;;  %v1071_v33 = vcombine.high %v1014_v30, %v1030_v24  ;;  %v1086_v16 = vcombine.low %v2354_v14, %v1037_v25  ;;  %v1813_v2 = vpop.eup %1812  ;;  %v1070_v28 = vcombine.low %v1014_v30, %v1030_v24 }
 0x260   :  { %v909_v23 = vmax.f32 %v877_v38, 1e-24  ;;  %v1815_v20 = vpop.eup %1814  ;;  %v2394_v52 = vmul.f32 %v1811_v26, %v2219_v1  ;;  %v1398_v62 = vcombine.low %v2380_v44, %v2371_v15  ;;  %v1087_v1 = vcombine.high %v2354_v14, %v1037_v25 }
 0x261   :  { %v2364_v7 = vrot.slane %v1071_v33, %v1972_v53  ;;  %v1817_v19 = vpop.eup %1816  ;;  %v1094_v47 = vrot.slane %v1086_v16, %v1972_v53  ;;  %v2383_v55 = vrot.slane %v1070_v28, %v1972_v53  ;;  %v2386_v56 = vmul.f32 %v1815_v20, %v2241_v59 }
 0x262   :  { %1830 = vrsqrt.f32 %v909_v23  ;;  %v1819_v37 = vpop.eup %1818  ;;  %v2389_v45 = vmul.f32 %v1817_v19, %v2239_v27  ;;  %v2401_v59 = vrot.slane %v1038_v41, %v1972_v53  ;;  %v2404_v27 = vmul.f32 %v1813_v2, %v2234_v22 }
 0x263   :  { %v1105_v31 = vcombine.high %v2361_v40, %v2364_v7  ;;  %v2407_v11 = vmul.f32 %v1819_v37, %v2227_v50  ;;  %v1106_v12 = vcombine.low %v1062_v0, %v1094_v47  ;;  %v1055_v50 = vcombine.high %v989_v60, %v2351_v63 }
 0x264   :  { %v1821_v39 = vpop.eup %1820  ;;  %v1102_v13 = vcombine.low %v2401_v59, %v2383_v55  ;;  %v1390_v14 = vrot.slane %v1382_v54, %v1961_v35  ;;  %v1107_v24 = vcombine.high %v1062_v0, %v1094_v47  ;;  %v1101_v8 = vrot.slane %v1087_v1, %v1972_v53 }
 0x265   :  { %v1823_v34 = vpop.eup %1822  ;;  %1536 = vrot.lane.b32.xlu0 %v1105_v31, %s1851_s21  ;;  %v2411_v57 = vmul.f32 %v1821_v39, %v2259_v36  ;;  %v1262_v30 = vcombine.low %v2407_v11, %v2389_v45  ;;  %v1278_v36 = vcombine.low %v2404_v27, %v2386_v56  ;;  %v1263_v1 = vcombine.high %v2407_v11, %v2389_v45 }
 0x266   :  { %v1825_v58 = vpop.eup %1824  ;;  %v953_v10 = vmul.f32 %v1823_v34, %v2257_v29  ;;  %v2427_v29 = vmul.f32 %v1809_v17, %v2126_v5  ;;  %v1406_v5 = vrot.slane %v1398_v62, %v1961_v35 }
 0x267   :  { %v2418_v22 = vmul.f32 %v1825_v58, %v2207_v43  ;;  %v1270_v26 = vrot.slane %v1262_v30, %v1961_v35  ;;  %v1286_v23 = vrot.slane %v1278_v36, %v1961_v35 }
 0x268   :  { %v1827_v42 = vpop.eup %1826  ;;  %v1414_v17 = vcombine.low %v2427_v29, %v2411_v57  ;;  %v1446_v20 = vcombine.low %v1390_v14, %v1406_v5 }
 0x269   :  { %v1829_v9 = vpop.eup %1828  ;;  %v957_v4 = vmul.f32 %v1827_v42, %v2267_v46  ;;  %1544 = vrot.lane.b32.xlu0 %v1106_v12, %s1852_s22  ;;  %v1246_v63 = vcombine.low %v2418_v22, %v2394_v52  ;;  %v1447_v42 = vcombine.high %v1390_v14, %v1406_v5 }
 0x26a   :  { %v2431_v43 = vmul.f32 %v1829_v9, %v2128_v6  ;;  %v1069_v6 = vrot.slane %v1055_v50, %v1972_v53  ;;  %v1422_v2 = vrot.slane %v1414_v17, %v1961_v35  ;;  %v1454_v31 = vrot.slane %v1446_v20, %v1972_v53 }
 0x26b   :  { %v1294_v46 = vcombine.low %v953_v10, %v957_v4  ;;  %v1254_v60 = vrot.slane %v1246_v63, %v1961_v35  ;;  %v1295_v62 = vcombine.high %v953_v10, %v957_v4  ;;  %v1279_v9 = vcombine.high %v2404_v27, %v2386_v56 }
 0x26c   :  { %v1831_v3 = vpop.eup %1830  ;;  %v1109_v41 = vcombine.high %v1069_v6, %v1101_v8  ;;  %v1247_v10 = vcombine.high %v2418_v22, %v2394_v52  ;;  %v1461_v14 = vrot.slane %v1447_v42, %v1972_v53  ;;  %v1277_v56 = vrot.slane %v1263_v1, %v1961_v35 }
 0x26d   :  { %v2437_v25 = vmul.f32 %v1831_v3, %v2273_v61  ;;  %v1302_v38 = vrot.slane %v1294_v46, %v1961_v35  ;;  %1552 = vrot.lane.b32.xlu0 %v1107_v24, %s1853_s23  ;;  %v1108_v61 = vcombine.low %v1069_v6, %v1101_v8  ;;  %v1310_v49 = vcombine.low %v1254_v60, %v1270_v26 }
 0x26e   :  { %v1311_v12 = vcombine.high %v1254_v60, %v1270_v26  ;;  %v1309_v4 = vrot.slane %v1295_v62, %v1961_v35  ;;  %v1293_v27 = vrot.slane %v1279_v9, %v1961_v35  ;;  %v1261_v52 = vrot.slane %v1247_v10, %v1961_v35 }
 0x26f   :  { %v1430_v33 = vcombine.low %v2431_v43, %v2437_v25  ;;  %v1342_v16 = vcombine.low %v1286_v23, %v1302_v38  ;;  %v1318_v39 = vrot.slane %v1310_v49, %v1972_v53  ;;  %v1343_v54 = vcombine.high %v1286_v23, %v1302_v38 }
 0x270   :  { %v1325_v45 = vrot.slane %v1311_v12, %v1972_v53  ;;  %v1431_v3 = vcombine.high %v2431_v43, %v2437_v25  ;;  %v1358_v22 = vcombine.low %v1293_v27, %v1309_v4  ;;  %v1383_v8 = vcombine.high %v2377_v51, %v2368_v32 }
 0x271   :  { %v1438_v28 = vrot.slane %v1430_v33, %v1961_v35  ;;  %1560 = vrot.lane.b32.xlu0 %v1108_v61, %s1854_s24  ;;  %v1350_v37 = vrot.slane %v1342_v16, %v1972_v53  ;;  %v1357_v46 = vrot.slane %v1343_v54, %v1972_v53  ;;  %v1399_v63 = vcombine.high %v2380_v44, %v2371_v15 }
 0x272   :  { %v1415_v38 = vcombine.high %v2427_v29, %v2411_v57  ;;  %v1326_v5 = vcombine.low %v1261_v52, %v1277_v56  ;;  %v1445_v43 = vrot.slane %v1431_v3, %v1961_v35  ;;  %v1366_v6 = vrot.slane %v1358_v22, %v1972_v53 }
 0x273   :  { %v1478_v19 = vcombine.low %v1422_v2, %v1438_v28  ;;  %v1479_v0 = vcombine.high %v1422_v2, %v1438_v28  ;;  %v1374_v58 = vcombine.low %v1318_v39, %v1350_v37  ;;  %v1375_v36 = vcombine.high %v1318_v39, %v1350_v37 }
 0x274   :  { %v1376_v24 = vcombine.low %v1325_v45, %v1357_v46  ;;  %v1377_v25 = vcombine.high %v1325_v45, %v1357_v46  ;;  %v1397_v26 = vrot.slane %v1383_v8, %v1961_v35  ;;  %v1413_v32 = vrot.slane %v1399_v63, %v1961_v35 }
 0x275   :  { %v1486_v47 = vrot.slane %v1478_v19, %v1972_v53  ;;  %1568 = vrot.lane.b32.xlu0 %v1109_v41, %s1855_s25  ;;  %v1493_v30 = vrot.slane %v1479_v0, %v1972_v53  ;;  %v1429_v51 = vrot.slane %v1415_v38, %v1961_v35  ;;  %v1334_v15 = vrot.slane %v1326_v5, %v1972_v53 }
 0x276   :  { %v1103_v44 = vcombine.high %v2401_v59, %v2383_v55  ;;  %v1359_v23 = vcombine.high %v1293_v27, %v1309_v4  ;;  %v1462_v33 = vcombine.low %v1397_v26, %v1413_v32  ;;  %v1327_v61 = vcombine.high %v1261_v52, %v1277_v56 }
 0x277   :  { %v1510_v34 = vcombine.low %v1454_v31, %v1486_v47  ;;  %v1511_v50 = vcombine.high %v1454_v31, %v1486_v47  ;;  %v1512_v11 = vcombine.low %v1461_v14, %v1493_v30  ;;  %v1513_v17 = vcombine.high %v1461_v14, %v1493_v30 }
 0x278   :  { %v1494_v57 = vcombine.low %v1429_v51, %v1445_v43  ;;  %v1378_v29 = vcombine.low %v1334_v15, %v1366_v6  ;;  %v1104_v60 = vcombine.low %v2361_v40, %v2364_v7  ;;  %v1379_v16 = vcombine.high %v1334_v15, %v1366_v6 }
 0x279   :  { %1578 = vrot.lane.b32.xlu1 %v1510_v34, %s1856_s26  ;;  %1576 = vrot.lane.b32.xlu0 %v1374_v58, %s1856_s26  ;;  %v1373_v2 = vrot.slane %v1359_v23, %v1972_v53  ;;  %v1470_v28 = vrot.slane %v1462_v33, %v1972_v53  ;;  %v1341_v20 = vrot.slane %v1327_v61, %v1972_v53 }
 0x27a   :  { %v1502_v35 = vrot.slane %v1494_v57, %v1972_v53  ;;  %v1495_v19 = vcombine.high %v1429_v51, %v1445_v43  ;;  %v1463_v37 = vcombine.high %v1397_v26, %v1413_v32 }
 0x27b   :  { %v1380_v41 = vcombine.low %v1341_v20, %v1373_v2  ;;  %v1381_v31 = vcombine.high %v1341_v20, %v1373_v2 }
 0x27c   :  { %v1514_v49 = vcombine.low %v1470_v28, %v1502_v35  ;;  %v1515_v40 = vcombine.high %v1470_v28, %v1502_v35  ;;  %v1509_v7 = vrot.slane %v1495_v19, %v1972_v53  ;;  %v1477_v47 = vrot.slane %v1463_v37, %v1972_v53 }
 0x27d   :  { %1586 = vrot.lane.b32.xlu1 %v1511_v50, %s1857_s27  ;;  %1584 = vrot.lane.b32.xlu0 %v1375_v36, %s1857_s27 }
 0x27e   :  { %v1516_v39 = vcombine.low %v1477_v47, %v1509_v7  ;;  %v1517_v34 = vcombine.high %v1477_v47, %v1509_v7 }
 0x281   :  { %1594 = vrot.lane.b32.xlu1 %v1512_v11, %s1858_s28  ;;  %1592 = vrot.lane.b32.xlu0 %v1376_v24, %s1858_s28 }
 0x285   :  { %1602 = vrot.lane.b32.xlu1 %v1513_v17, %s1859_s29  ;;  %1600 = vrot.lane.b32.xlu0 %v1377_v25, %s1859_s29 }
 0x289   :  { %1520 = vrot.lane.b32.xlu1 %v1103_v44, %s1850_s20  ;;  %1608 = vrot.lane.b32.xlu0 %v1378_v29, %s1860_s30 }
 0x28d   :  { %1528 = vrot.lane.b32.xlu1 %v1104_v60, %s1849_s19  ;;  %1616 = vrot.lane.b32.xlu0 %v1379_v16, %s1861_s4 }
 0x291   :  { %1610 = vrot.lane.b32.xlu1 %v1514_v49, %s1860_s30  ;;  %1624 = vrot.lane.b32.xlu0 %v1380_v41, %s1862_s5 }
 0x295   :  { %1618 = vrot.lane.b32.xlu1 %v1515_v40, %s1861_s4  ;;  %1632 = vrot.lane.b32.xlu0 %v1381_v31, %s1863_s6 }
 0x299   :  { %1626 = vrot.lane.b32.xlu1 %v1516_v39, %s1862_s5 }
 0x29d   :  { %1634 = vrot.lane.b32.xlu1 %v1517_v34, %s1863_s6 }
 0x2a4   :  { %v1531_v0 = vpop.permute.xlu1 %1530  ;;  %v1523_v54 = vpop.permute.xlu0 %1522 }
 0x2a5   :  { %v1639_v8 = vsel %vm781_vm1, %v1238_v48, %v1523_v54 }
 0x2a6   :  { %v1642_v43 = vsel %vm1640_vm2, %v1639_v8, %v1531_v0 }
 0x2a8   :  { %v1539_v58 = vpop.permute.xlu1 %1538 }
 0x2a9   :  { %v1645_v55 = vsel %vm1643_vm3, %v1642_v43, %v1539_v58 }
 0x2ac   :  { %v1547_v62 = vpop.permute.xlu1 %1546 }
 0x2b0   :  { %v1555_v12 = vpop.permute.xlu1 %1554 }
 0x2b4   :  { %v1563_v50 = vpop.permute.xlu1 %1562 }
 0x2b8   :  { %v1571_v36 = vpop.permute.xlu1 %1570 }
 0x2d7   :  { %v1537_v42 = vpop.permute.xlu0 %1536 }
 0x2db   :  { %v1545_v1 = vpop.permute.xlu0 %1544 }
 0x2df   :  { %v1553_v9 = vpop.permute.xlu0 %1552 }
 0x2e3   :  { %v1561_v30 = vpop.permute.xlu0 %1560 }
 0x2e7   :  { %v1569_v46 = vpop.permute.xlu0 %1568 }
 0x2eb   :  { %v1579_v10 = vpop.permute.xlu1 %1578  ;;  %v1577_v53 = vpop.permute.xlu0 %1576 }
 0x2ef   :  { %v1587_v4 = vpop.permute.xlu1 %1586  ;;  %v1585_v14 = vpop.permute.xlu0 %1584 }
 0x2f3   :  { %v1595_v45 = vpop.permute.xlu1 %1594  ;;  %v1593_v56 = vpop.permute.xlu0 %1592 }
 0x2f7   :  { %v1603_v27 = vpop.permute.xlu1 %1602  ;;  %v1601_v11 = vpop.permute.xlu0 %1600 }
 0x2fb   :  { %v1521_v3 = vpop.permute.xlu1 %1520  ;;  %v1609_v24 = vpop.permute.xlu0 %1608 }
 0x2fc   :  { %v1638_v52 = vsel %vm781_vm1, %v1102_v13, %v1521_v3  ;;  %v1648_v13 = vsel %vm1646_vm4, %v1645_v55, %v1547_v62 }
 0x2fd   :  { %v1651_v18 = vsel %vm1649_vm5, %v1648_v13, %v1555_v12 }
 0x2fe   :  { %v1654_v32 = vsel %vm1652_vm6, %v1651_v18, %v1563_v50 }
 0x2ff   :  { %v1529_v22 = vpop.permute.xlu1 %1528  ;;  %v1617_v38 = vpop.permute.xlu0 %1616  ;;  %v1657_v44 = vsel %vm1655_vm7, %v1654_v32, %v1571_v36 }
 0x300   :  { %v1641_v63 = vsel %vm1640_vm2, %v1638_v52, %v1529_v22  ;;  %v1660_v29 = vsel %vm1658_vm8, %v1657_v44, %v1579_v10 }
 0x301   :  { %v1644_v5 = vsel %vm1643_vm3, %v1641_v63, %v1537_v42  ;;  %v1663_v33 = vsel %vm1661_vm9, %v1660_v29, %v1587_v4 }
 0x302   :  { %v1647_v17 = vsel %vm1646_vm4, %v1644_v5, %v1545_v1  ;;  %v1666_v60 = vsel %vm1664_vm10, %v1663_v33, %v1595_v45 }
 0x303   :  { %v1650_v25 = vsel %vm1649_vm5, %v1647_v17, %v1553_v9  ;;  %v1611_v6 = vpop.permute.xlu1 %1610  ;;  %v1625_v48 = vpop.permute.xlu0 %1624  ;;  %v1669_v2 = vsel %vm1667_vm11, %v1666_v60, %v1603_v27 }
 0x304   :  { %v1653_v59 = vsel %vm1652_vm6, %v1650_v25, %v1561_v30  ;;  %v1672_v49 = vsel %vm1670_vm12, %v1669_v2, %v1611_v6 }
 0x305   :  { %v1656_v26 = vsel %vm1655_vm7, %v1653_v59, %v1569_v46 }
 0x306   :  { %v1659_v21 = vsel %vm1658_vm8, %v1656_v26, %v1577_v53 }
 0x307   :  { %v1662_v51 = vsel %vm1661_vm9, %v1659_v21, %v1585_v14  ;;  %v1619_v15 = vpop.permute.xlu1 %1618  ;;  %v1633_v20 = vpop.permute.xlu0 %1632 }
 0x308   :  { %v1665_v57 = vsel %vm1664_vm10, %v1662_v51, %v1593_v56  ;;  %v1675_v41 = vsel %vm1673_vm14, %v1672_v49, %v1619_v15 }
 0x309   :  { %v1668_v23 = vsel %vm1667_vm11, %v1665_v57, %v1601_v11 }
 0x30a   :  { %v1671_v61 = vsel %vm1670_vm12, %v1668_v23, %v1609_v24 }
 0x30b   :  { %v1674_v35 = vsel %vm1673_vm14, %v1671_v61, %v1617_v38  ;;  %v1627_v16 = vpop.permute.xlu1 %1626 }
 0x30c   :  { %v1677_v28 = vsel %vm1676_vm13, %v1674_v35, %v1625_v48  ;;  %v1678_v37 = vsel %vm1676_vm13, %v1675_v41, %v1627_v16 }
 0x30d   :  { %v1680_v19 = vsel %vm1679_vm15, %v1677_v28, %v1633_v20 }
 0x30e   :  { %1682 = vst.msk [vmem:[%s2519_s3] sm:$0xff] %vm31_vm0, %v1680_v19 }
 0x30f   :  { %v1635_v40 = vpop.permute.xlu1 %1634 }
 0x310   :  { %v1681_v7 = vsel %vm1679_vm15, %v1678_v37, %v1635_v40 }
 0x311   :  { %1683 = vst.msk [vmem:[%s2519_s3 + $0x8] sm:$0xff] %vm31_vm0, %v1681_v7 }

</bundles_post_ra>
